<compile_context>
chip_gen: v5e
topology: v5e:2x2
jax: 0.10.0
libtpu: 0.0.40
codegen_flags: <defaults>
</compile_context>

<pallas_src>
import functools

import jax
import jax.numpy as jnp
from jax import lax
from jax.experimental import pallas as pl
from jax.experimental.pallas import tpu as pltpu


# ---------------------------------------------------------------------------
# Generation-aware compiler params / tiling helpers
# ---------------------------------------------------------------------------
@functools.lru_cache(maxsize=None)
def _vmem_limit_bytes():
    """~half of physical VMEM: 64MB on 128MiB parts (v5e/v6e), 32MB on v7x."""
    try:
        cap = pltpu.get_tpu_info().vmem_capacity_bytes
    except Exception:
        cap = 64 * 1024 * 1024  # conservative fallback -> 32MB limit
    return max(32 * 1024 * 1024, min(64 * 1024 * 1024, cap // 2))


def _cparams(dims):
    return pltpu.CompilerParams(dimension_semantics=dims,
                                vmem_limit_bytes=_vmem_limit_bytes())


def _round_up(x, m):
    return ((x + m - 1) // m) * m


def _choose_tm(m, prefer_multi_tile=False):
    """Largest M tile (<=1024); optionally keep >=2 M tiles (v7x: 2 TensorCores)."""
    for tm in (1024, 512, 256, 128):
        if m >= tm:
            if prefer_multi_tile and m < 2 * tm and tm > 128:
                continue
            return tm
    return _round_up(m, 8)


def _choose_tile(n, candidates=(512, 256, 128)):
    """N/K tile: multiple of 128 (256+ preferred) or the full dimension."""
    for t in candidates:
        if n % t == 0:
            return t
    return n


def _choose_row_block(ho, wo, c, target_rows=256, vmem_budget=6 * 1024 * 1024):
    """TH = smallest divisor of Ho with TH*Wo >= target_rows, capped by VMEM."""
    target = max(1, -(-target_rows // wo))
    divisors = [d for d in range(1, ho + 1) if ho % d == 0]
    th = next((d for d in divisors if d >= target), ho)
    while th > 1 and th * wo * c * 9 * 2 > vmem_budget:
        smaller = [d for d in divisors if d < th]
        if not smaller:
            break
        th = smaller[-1]
    return th


# ---------------------------------------------------------------------------
# Kernels
# ---------------------------------------------------------------------------
def _mm_bias_kernel(x_ref, w_ref, b_ref, o_ref, acc_ref, *, relu):
    """K-tiled (TM,TK)@(TK,TN) with f32 VMEM accumulator; epilogue: +bias (+ReLU)."""
    @pl.when(pl.program_id(2) == 0)
    def _init():
        acc_ref[...] = jnp.zeros_like(acc_ref)

    acc_ref[...] += jnp.dot(x_ref[...], w_ref[...],
                            preferred_element_type=jnp.float32)

    @pl.when(pl.program_id(2) == pl.num_programs(2) - 1)
    def _epilogue():
        y = acc_ref[...] + b_ref[...]
        if relu:
            y = jnp.maximum(y, 0.0)
        o_ref[...] = y.astype(o_ref.dtype)


def _conv3_proj_kernel(y_ref, w3_ref, xs_ref, ws_ref, b_ref, o_ref):
    """Fused: conv3 matmul + shortcut-projection matmul + combined bias + ReLU."""
    acc = jnp.dot(y_ref[...], w3_ref[...], preferred_element_type=jnp.float32)
    acc = acc + jnp.dot(xs_ref[...], ws_ref[...],
                        preferred_element_type=jnp.float32)
    acc = acc + b_ref[...]
    o_ref[...] = jnp.maximum(acc, 0.0).astype(o_ref.dtype)


def _conv3_identity_kernel(y_ref, w3_ref, b_ref, res_ref, o_ref):
    """Fused: conv3 matmul + bias + identity residual (kept f32) + ReLU."""
    acc = jnp.dot(y_ref[...], w3_ref[...], preferred_element_type=jnp.float32)
    acc = acc + b_ref[...] + res_ref[...]
    o_ref[...] = jnp.maximum(acc, 0.0).astype(o_ref.dtype)


def _conv3x3_kernel(*args, n_planes, slab_plan, tap_plan, th, wo):
    """A block of TH output rows of a 3x3 conv (+folded BN bias + ReLU).

    args = plane_refs... + [w_ref(9,C,Cout), b_ref(1,Cout), o_ref(1,TH,Wo,Cout)]
    slab_plan: static tuple of (plane_ref_index, row_offset qy)
    tap_plan : static tuple of (slab_index, column_offset qx, tap_index)
    """
    plane_refs = args[:n_planes]
    w_ref = args[n_planes]
    b_ref = args[n_planes + 1]
    o_ref = args[n_planes + 2]

    row0 = pl.multiple_of(pl.program_id(1) * th, th)

    # Load each (plane, qy) slab of TH rows exactly once per step.
    slabs = []
    for p_idx, qy in slab_plan:
        slabs.append(plane_refs[p_idx][0, pl.ds(row0 + qy, th), :, :])  # (TH,Wp,C)

    acc = None
    for s_idx, qx, tap in tap_plan:
        xt = slabs[s_idx][:, qx:qx + wo, :].reshape(th * wo, -1)        # (TH*Wo,C)
        contrib = jnp.dot(xt, w_ref[tap], preferred_element_type=jnp.float32)
        acc = contrib if acc is None else acc + contrib

    y = jnp.maximum(acc + b_ref[...], 0.0)                              # f32 epilogue
    o_ref[0] = y.reshape(th, wo, -1).astype(o_ref.dtype)


# ---------------------------------------------------------------------------
# Pallas wrappers
# ---------------------------------------------------------------------------
def matmul_bias(x2d, w, bias, *, relu, out_dtype=jnp.bfloat16):
    """bf16 tiled matmul + bias (+ReLU) with f32 accumulation (1x1 conv + BN)."""
    m, k = x2d.shape
    n = w.shape[1]
    x2d = x2d.astype(jnp.bfloat16)
    w = w.astype(jnp.bfloat16)
    bias = bias.reshape(1, n).astype(jnp.float32)

    tm = _choose_tm(m)
    mp = _round_up(m, tm)
    if mp != m:
        x2d = jnp.pad(x2d, ((0, mp - m), (0, 0)))
    tn = _choose_tile(n)
    tk = k if k <= 2048 else _choose_tile(k)   # full-K for 1x1 convs

    kernel = functools.partial(_mm_bias_kernel, relu=relu)
    out = pl.pallas_call(
        kernel,
        out_shape=jax.ShapeDtypeStruct((mp, n), out_dtype),
        grid=(mp // tm, n // tn, k // tk),
        in_specs=[
            pl.BlockSpec((tm, tk), lambda i, j, kk: (i, kk)),
            pl.BlockSpec((tk, tn), lambda i, j, kk: (kk, j)),
            pl.BlockSpec((1, tn), lambda i, j, kk: (0, j)),
        ],
        out_specs=pl.BlockSpec((tm, tn), lambda i, j, kk: (i, j)),
        scratch_shapes=[pltpu.VMEM((tm, tn), jnp.float32)],
        compiler_params=_cparams(("parallel", "parallel", "arbitrary")),
    )(x2d, w, bias)
    return out[:m] if mp != m else out


def conv3x3_bn_relu(x_nhwc, w_oihw, scale, bias, stride):
    """3x3 conv (pad=1, stride) + folded BN + ReLU, row-block streamed (no HBM im2col)."""
    b_sz, h, w_sz, c = x_nhwc.shape
    cout = w_oihw.shape[0]
    ho = (h + 2 - 3) // stride + 1
    wo = (w_sz + 2 - 3) // stride + 1

    # Fold BN scale into per-tap weights: (Cout,C,3,3) -> (9, C, Cout), bf16.
    w = jnp.transpose(w_oihw, (2, 3, 1, 0)).reshape(9, c, cout)
    w = (w * scale.reshape(1, 1, cout)).astype(jnp.bfloat16)
    b = bias.reshape(1, cout).astype(jnp.float32)

    xp = jnp.pad(x_nhwc.astype(jnp.bfloat16), ((0, 0), (1, 1), (1, 1), (0, 0)))

    # Parity-plane decomposition: tap (dy,dx) reads plane (dy%s, dx%s) at
    # (row+dy//s, col+dx//s).  Total plane bytes == one copy of the input.
    plane_arrays, plane_idx = [], {}
    slab_plan, slab_idx = [], {}       # slab = (plane_index, qy)
    tap_plan = []                      # (slab_index, qx, tap_index)
    for dy in range(3):
        ry, qy = dy % stride, dy // stride
        for dx in range(3):
            rx, qx = dx % stride, dx // stride
            pk = (ry, rx)
            if pk not in plane_idx:
                plane_idx[pk] = len(plane_arrays)
                plane_arrays.append(xp[:, ry::stride, rx::stride, :])
            sk = (plane_idx[pk], qy)
            if sk not in slab_idx:
                slab_idx[sk] = len(slab_plan)
                slab_plan.append(sk)
            tap_plan.append((slab_idx[sk], qx, dy * 3 + dx))

    th = _choose_row_block(ho, wo, c)
    nrb = ho // th

    plane_specs = [
        pl.BlockSpec((1,) + p.shape[1:], lambda bb, hh: (bb, 0, 0, 0))
        for p in plane_arrays
    ]

    kernel = functools.partial(
        _conv3x3_kernel, n_planes=len(plane_arrays),
        slab_plan=tuple(slab_plan), tap_plan=tuple(tap_plan), th=th, wo=wo)

    y = pl.pallas_call(
        kernel,
        out_shape=jax.ShapeDtypeStruct((b_sz, ho, wo, cout), jnp.bfloat16),
        grid=(b_sz, nrb),
        in_specs=plane_specs + [
            pl.BlockSpec((9, c, cout), lambda bb, hh: (0, 0, 0)),
            pl.BlockSpec((1, cout), lambda bb, hh: (0, 0)),
        ],
        out_specs=pl.BlockSpec((1, th, wo, cout), lambda bb, hh: (bb, hh, 0, 0)),
        compiler_params=_cparams(("parallel", "parallel")),
    )(*plane_arrays, w, b)
    return y


def fused_conv3_proj(y2d, w3, b3, xs2d, ws, bs, out_dtype=jnp.float32):
    """out = relu(y2d@w3 + xs2d@ws + (b3+bs)); shortcut projection fused in."""
    m, k1 = y2d.shape
    k2 = xs2d.shape[1]
    n = w3.shape[1]
    y2d = y2d.astype(jnp.bfloat16)
    xs2d = xs2d.astype(jnp.bfloat16)
    w3 = w3.astype(jnp.bfloat16)
    ws = ws.astype(jnp.bfloat16)
    b = (b3 + bs).reshape(1, n).astype(jnp.float32)

    tm = _choose_tm(m, prefer_multi_tile=True)
    mp = _round_up(m, tm)
    if mp != m:
        y2d = jnp.pad(y2d, ((0, mp - m), (0, 0)))
        xs2d = jnp.pad(xs2d, ((0, mp - m), (0, 0)))
    tn = _choose_tile(n)

    out = pl.pallas_call(
        _conv3_proj_kernel,
        out_shape=jax.ShapeDtypeStruct((mp, n), out_dtype),
        grid=(mp // tm, n // tn),
        in_specs=[
            pl.BlockSpec((tm, k1), lambda i, j: (i, 0)),
            pl.BlockSpec((k1, tn), lambda i, j: (0, j)),
            pl.BlockSpec((tm, k2), lambda i, j: (i, 0)),
            pl.BlockSpec((k2, tn), lambda i, j: (0, j)),
            pl.BlockSpec((1, tn), lambda i, j: (0, j)),
        ],
        out_specs=pl.BlockSpec((tm, tn), lambda i, j: (i, j)),
        compiler_params=_cparams(("parallel", "parallel")),
    )(y2d, w3, xs2d, ws, b)
    return out[:m] if mp != m else out


def fused_conv3_identity(y2d, w3, b3, res2d, out_dtype=jnp.float32):
    """out = relu(y2d@w3 + b3 + residual); residual stays f32 (VPU add only)."""
    m, k1 = y2d.shape
    n = w3.shape[1]
    y2d = y2d.astype(jnp.bfloat16)
    res2d = res2d.astype(jnp.float32)
    w3 = w3.astype(jnp.bfloat16)
    b = b3.reshape(1, n).astype(jnp.float32)

    tm = _choose_tm(m, prefer_multi_tile=True)
    mp = _round_up(m, tm)
    if mp != m:
        y2d = jnp.pad(y2d, ((0, mp - m), (0, 0)))
        res2d = jnp.pad(res2d, ((0, mp - m), (0, 0)))
    tn = _choose_tile(n)

    out = pl.pallas_call(
        _conv3_identity_kernel,
        out_shape=jax.ShapeDtypeStruct((mp, n), out_dtype),
        grid=(mp // tm, n // tn),
        in_specs=[
            pl.BlockSpec((tm, k1), lambda i, j: (i, 0)),
            pl.BlockSpec((k1, tn), lambda i, j: (0, j)),
            pl.BlockSpec((1, tn), lambda i, j: (0, j)),
            pl.BlockSpec((tm, tn), lambda i, j: (i, j)),
        ],
        out_specs=pl.BlockSpec((tm, tn), lambda i, j: (i, j)),
        compiler_params=_cparams(("parallel", "parallel")),
    )(y2d, w3, b, res2d)
    return out[:m] if mp != m else out


# ---------------------------------------------------------------------------
# Parameter folding / forward
# ---------------------------------------------------------------------------
def _fold_bn(gamma, beta, mean, var, eps=1e-5):
    scale = gamma / jnp.sqrt(var + eps)
    bias = beta - mean * scale
    return scale.reshape(1, -1), bias.reshape(1, -1)


def make_bottleneck_params(key, in_channels, out_channels):
    """Deterministic synthetic parameters matching the nn.Module shapes."""
    expansion = 4
    ks = jax.random.split(key, 16)
    p = {}
    p["w1"] = 0.1 * jax.random.normal(ks[0], (out_channels, in_channels, 1, 1), jnp.float32)
    p["bn1"] = (1.0 + 0.1 * jax.random.normal(ks[1], (out_channels,)),
                0.1 * jax.random.normal(ks[2], (out_channels,)),
                0.1 * jax.random.normal(ks[3], (out_channels,)),
                1.0 + 0.1 * jnp.abs(jax.random.normal(ks[4], (out_channels,))))
    p["w2"] = 0.1 * jax.random.normal(ks[5], (out_channels, out_channels, 3, 3), jnp.float32)
    p["bn2"] = (1.0 + 0.1 * jax.random.normal(ks[6], (out_channels,)),
                0.1 * jax.random.normal(ks[7], (out_channels,)),
                0.1 * jax.random.normal(ks[8], (out_channels,)),
                1.0 + 0.1 * jnp.abs(jax.random.normal(ks[9], (out_channels,))))
    oc4 = out_channels * expansion
    p["w3"] = 0.1 * jax.random.normal(ks[10], (oc4, out_channels, 1, 1), jnp.float32)
    p["bn3"] = (1.0 + 0.1 * jax.random.normal(ks[11], (oc4,)),
                0.1 * jax.random.normal(ks[12], (oc4,)),
                0.1 * jax.random.normal(ks[13], (oc4,)),
                1.0 + 0.1 * jnp.abs(jax.random.normal(ks[14], (oc4,))))
    p["ws"] = 0.1 * jax.random.normal(ks[15], (oc4, in_channels, 1, 1), jnp.float32)
    kb = jax.random.split(ks[15], 5)
    p["bns"] = (1.0 + 0.1 * jax.random.normal(kb[0], (oc4,)),
                0.1 * jax.random.normal(kb[1], (oc4,)),
                0.1 * jax.random.normal(kb[2], (oc4,)),
                1.0 + 0.1 * jnp.abs(jax.random.normal(kb[3], (oc4,))))
    return p


def bottleneck_forward(x_nchw, params, in_channels, out_channels, stride=1):
    expansion = 4
    oc4 = out_channels * expansion
    x = jnp.transpose(x_nchw, (0, 2, 3, 1)).astype(jnp.float32)   # -> NHWC
    n, h, w, c = x.shape

    # conv1 1x1 + BN + ReLU (BN scale folded into weights)
    s1, b1 = _fold_bn(*params["bn1"])
    w1 = params["w1"][:, :, 0, 0].T * s1                          # (Cin, oc)
    y1 = matmul_bias(x.reshape(n * h * w, c), w1, b1, relu=True)
    y1 = y1.reshape(n, h, w, out_channels)

    # conv2 3x3 stride + BN + ReLU (row-block streamed 9-tap accumulation)
    s2, b2 = _fold_bn(*params["bn2"])
    y2 = conv3x3_bn_relu(y1, params["w2"], s2, b2, stride)
    _, ho, wo, _ = y2.shape
    y2d = y2.reshape(n * ho * wo, out_channels)

    # conv3 1x1 + BN fused with shortcut + residual add + final ReLU
    s3, b3 = _fold_bn(*params["bn3"])
    w3 = params["w3"][:, :, 0, 0].T * s3                          # (oc, oc4)
    use_proj = (stride != 1) or (in_channels != oc4)
    if use_proj:
        ss, bs = _fold_bn(*params["bns"])
        ws = params["ws"][:, :, 0, 0].T * ss                      # (Cin, oc4)
        xs = x[:, ::stride, ::stride, :].reshape(n * ho * wo, c)
        out2d = fused_conv3_proj(y2d, w3, b3, xs, ws, bs)
    else:
        out2d = fused_conv3_identity(y2d, w3, b3, x.reshape(n * ho * wo, c))

    out = out2d.reshape(n, ho, wo, oc4)
    return jnp.transpose(out, (0, 3, 1, 2))                       # -> NCHW


# ---------------------------------------------------------------------------
# Pure-JAX reference (lax.conv, f32) for correctness checking
# ---------------------------------------------------------------------------
def _ref_conv(x_nhwc, w_oihw, stride, padding):
    w_hwio = jnp.transpose(w_oihw, (2, 3, 1, 0))
    return lax.conv_general_dilated(
        x_nhwc, w_hwio, window_strides=(stride, stride),
        padding=[(padding, padding), (padding, padding)],
        dimension_numbers=("NHWC", "HWIO", "NHWC"))


def _ref_bn(x, bn):
    g, b, m, v = bn
    return (x - m) / jnp.sqrt(v + 1e-5) * g + b


def bottleneck_reference(x_nchw, params, in_channels, out_channels, stride=1):
    oc4 = out_channels * 4
    x = jnp.transpose(x_nchw, (0, 2, 3, 1)).astype(jnp.float32)
    y = jax.nn.relu(_ref_bn(_ref_conv(x, params["w1"], 1, 0), params["bn1"]))
    y = jax.nn.relu(_ref_bn(_ref_conv(y, params["w2"], stride, 1), params["bn2"]))
    y = _ref_bn(_ref_conv(y, params["w3"], 1, 0), params["bn3"])
    if stride != 1 or in_channels != oc4:
        sc = _ref_bn(_ref_conv(x, params["ws"], stride, 0), params["bns"])
    else:
        sc = x
    out = jax.nn.relu(y + sc)
    return jnp.transpose(out, (0, 3, 1, 2))


# ---------------------------------------------------------------------------
if __name__ == "__main__":
    key = jax.random.PRNGKey(0)
    k_x, k_p = jax.random.split(key)

    batch, in_channels, out_channels, spatial, stride = 2, 4, 4, 16, 2
    x = jax.random.normal(k_x, (batch, in_channels, spatial, spatial), jnp.float32)
    params = make_bottleneck_params(k_p, in_channels, out_channels)

    fwd = jax.jit(bottleneck_forward, static_argnums=(2, 3, 4))
    out = jax.block_until_ready(fwd(x, params, in_channels, out_channels, stride))
    ref = jax.block_until_ready(
        bottleneck_reference(x, params, in_channels, out_channels, stride))

    assert out.shape == (batch, out_channels * 4, spatial // stride, spatial // stride)
    max_err = float(jnp.max(jnp.abs(out - ref)))
    # bf16 MXU inputs -> looser tolerance than an all-f32 version.
    assert max_err < 5e-2, f"mismatch vs reference: max abs err {max_err}"
    print("KERNEL_OK")
</pallas_src>

<mosaic_0001>
module attributes {stable_mosaic.version = 11 : i64} {
  func.func @_mm_bias_kernel(%arg0: i32, %arg1: i32, %arg2: i32, %arg3: memref<512x4xbf16, #tpu.memory_space<vmem>>, %arg4: memref<4x4xbf16, #tpu.memory_space<vmem>>, %arg5: memref<1x4xf32, #tpu.memory_space<vmem>>, %arg6: memref<512x4xbf16, #tpu.memory_space<vmem>>, %arg7: memref<512x4xf32, #tpu.memory_space<vmem>>) attributes {dimension_semantics = [#tpu.dimension_semantics<parallel>, #tpu.dimension_semantics<parallel>, #tpu.dimension_semantics<arbitrary>], iteration_bounds = array<i64: 1, 1, 1>, scalar_prefetch = 0 : i64, scratch_operands = 1 : i64, tpu.core_type = #tpu.core_type<tc>, window_params = [{transform_indices = @transform_0, window_bounds = array<i64: 512, 4>}, {transform_indices = @transform_1, window_bounds = array<i64: 4, 4>}, {transform_indices = @transform_2, window_bounds = array<i64: 1, 4>}, {transform_indices = @transform_3, window_bounds = array<i64: 512, 4>}]} {
    %c0_i32 = arith.constant 0 : i32
    %0 = arith.cmpi eq, %arg2, %c0_i32 : i32
    %1 = arith.extui %0 : i1 to i32
    %c0_i32_0 = arith.constant 0 : i32
    %2 = arith.cmpi ne, %1, %c0_i32_0 : i32
    scf.if %2 {
      %cst_10 = arith.constant 0.000000e+00 : f32
      %12 = vector.broadcast %cst_10 : f32 to vector<512x4xf32>
      %c0_11 = arith.constant 0 : index
      %c0_12 = arith.constant 0 : index
      %13 = vector.load %arg7[%c0_11, %c0_12] : memref<512x4xf32, #tpu.memory_space<vmem>>, vector<512x4xf32>
      tpu.vector_store %arg7[%c0_11, %c0_12], %12 {strides = array<i32>} : memref<512x4xf32, #tpu.memory_space<vmem>>, vector<512x4xf32>,
    } else {
    }
    %c0 = arith.constant 0 : index
    %c0_1 = arith.constant 0 : index
    %3 = vector.load %arg7[%c0, %c0_1] : memref<512x4xf32, #tpu.memory_space<vmem>>, vector<512x4xf32>
    %c0_2 = arith.constant 0 : index
    %c0_3 = arith.constant 0 : index
    %4 = vector.load %arg3[%c0_2, %c0_3] : memref<512x4xbf16, #tpu.memory_space<vmem>>, vector<512x4xbf16>
    %c0_4 = arith.constant 0 : index
    %c0_5 = arith.constant 0 : index
    %5 = vector.load %arg4[%c0_4, %c0_5] : memref<4x4xbf16, #tpu.memory_space<vmem>>, vector<4x4xbf16>
    %cst = arith.constant dense<0.000000e+00> : vector<512x4xf32>
    %6 = tpu.matmul %4, %5, %cst {dimension_numbers = #tpu.dot_dimension_numbers<[1], [0], [0], [1], [0, 0, 1, 1], [], []>} : vector<512x4xbf16>, vector<4x4xbf16>, vector<512x4xf32> -> vector<512x4xf32>
    %7 = arith.addf %3, %6 : vector<512x4xf32>
    %c0_6 = arith.constant 0 : index
    %c0_7 = arith.constant 0 : index
    %8 = vector.load %arg7[%c0_6, %c0_7] : memref<512x4xf32, #tpu.memory_space<vmem>>, vector<512x4xf32>
    tpu.vector_store %arg7[%c0_6, %c0_7], %7 {strides = array<i32>} : memref<512x4xf32, #tpu.memory_space<vmem>>, vector<512x4xf32>,
    %c0_i32_8 = arith.constant 0 : i32
    %9 = arith.cmpi eq, %arg2, %c0_i32_8 : i32
    %10 = arith.extui %9 : i1 to i32
    %c0_i32_9 = arith.constant 0 : i32
    %11 = arith.cmpi ne, %10, %c0_i32_9 : i32
    scf.if %11 {
      %c0_10 = arith.constant 0 : index
      %c0_11 = arith.constant 0 : index
      %12 = vector.load %arg7[%c0_10, %c0_11] : memref<512x4xf32, #tpu.memory_space<vmem>>, vector<512x4xf32>
      %c0_12 = arith.constant 0 : index
      %c0_13 = arith.constant 0 : index
      %13 = vector.load %arg5[%c0_12, %c0_13] : memref<1x4xf32, #tpu.memory_space<vmem>>, vector<1x4xf32>
      %14 = vector.broadcast %13 : vector<1x4xf32> to vector<512x4xf32>
      %15 = arith.addf %12, %14 : vector<512x4xf32>
      %cst_14 = arith.constant 0.000000e+00 : f32
      %16 = vector.broadcast %cst_14 : f32 to vector<512x4xf32>
      %17 = arith.maximumf %15, %16 : vector<512x4xf32>
      %18 = arith.truncf %17 : vector<512x4xf32> to vector<512x4xbf16>
      %c0_15 = arith.constant 0 : index
      %c0_16 = arith.constant 0 : index
      %19 = vector.load %arg6[%c0_15, %c0_16] : memref<512x4xbf16, #tpu.memory_space<vmem>>, vector<512x4xbf16>
      tpu.vector_store %arg6[%c0_15, %c0_16], %18 {strides = array<i32>} : memref<512x4xbf16, #tpu.memory_space<vmem>>, vector<512x4xbf16>,
    } else {
    }
    return
  }
  func.func @transform_0(%arg0: i32, %arg1: i32, %arg2: i32) -> (i32, i32) {
    %c0_i32 = arith.constant 0 : i32
    return %arg0, %arg2 : i32, i32
  }
  func.func @transform_1(%arg0: i32, %arg1: i32, %arg2: i32) -> (i32, i32) {
    %c0_i32 = arith.constant 0 : i32
    return %arg2, %arg1 : i32, i32
  }
  func.func @transform_2(%arg0: i32, %arg1: i32, %arg2: i32) -> (i32, i32) {
    %c0_i32 = arith.constant 0 : i32
    %c0_i32_0 = arith.constant 0 : i32
    return %c0_i32, %arg1 : i32, i32
  }
  func.func @transform_3(%arg0: i32, %arg1: i32, %arg2: i32) -> (i32, i32) {
    %c0_i32 = arith.constant 0 : i32
    return %arg0, %arg1 : i32, i32
  }
}

module attributes {stable_mosaic.version = 11 : i64} {
  func.func @_conv3x3_kernel(%arg0: i32, %arg1: i32, %arg2: memref<1x9x9x4xbf16, #tpu.memory_space<vmem>>, %arg3: memref<1x9x9x4xbf16, #tpu.memory_space<vmem>>, %arg4: memref<1x9x9x4xbf16, #tpu.memory_space<vmem>>, %arg5: memref<1x9x9x4xbf16, #tpu.memory_space<vmem>>, %arg6: memref<9x4x4xbf16, #tpu.memory_space<vmem>>, %arg7: memref<1x4xf32, #tpu.memory_space<vmem>>, %arg8: memref<1x8x8x4xbf16, #tpu.memory_space<vmem>>) attributes {dimension_semantics = [#tpu.dimension_semantics<parallel>, #tpu.dimension_semantics<parallel>], iteration_bounds = array<i64: 2, 1>, scalar_prefetch = 0 : i64, scratch_operands = 0 : i64, tpu.core_type = #tpu.core_type<tc>, window_params = [{transform_indices = @transform_0, window_bounds = array<i64: 1, 9, 9, 4>}, {transform_indices = @transform_1, window_bounds = array<i64: 1, 9, 9, 4>}, {transform_indices = @transform_2, window_bounds = array<i64: 1, 9, 9, 4>}, {transform_indices = @transform_3, window_bounds = array<i64: 1, 9, 9, 4>}, {pipeline_mode = #tpu.pipeline_mode<synchronous>, transform_indices = @transform_4, window_bounds = array<i64: 9, 4, 4>}, {pipeline_mode = #tpu.pipeline_mode<synchronous>, transform_indices = @transform_5, window_bounds = array<i64: 1, 4>}, {transform_indices = @transform_6, window_bounds = array<i64: 1, 8, 8, 4>}]} {
    %c8_i32 = arith.constant 8 : i32
    %0 = arith.muli %arg1, %c8_i32 : i32
    %1 = tpu.assume_multiple %0, 8 : i32
    %c0_i32 = arith.constant 0 : i32
    %2 = arith.addi %1, %c0_i32 : i32
    %c0 = arith.constant 0 : index
    %3 = arith.index_cast %2 : i32 to index
    %c0_0 = arith.constant 0 : index
    %c0_1 = arith.constant 0 : index
    %4 = vector.load %arg2[%c0, %3, %c0_0, %c0_1] : memref<1x9x9x4xbf16, #tpu.memory_space<vmem>>, vector<1x8x9x4xbf16>
    %5 = vector.shape_cast %4 : vector<1x8x9x4xbf16> to vector<8x9x4xbf16>
    %c0_i32_2 = arith.constant 0 : i32
    %6 = arith.addi %1, %c0_i32_2 : i32
    %c0_3 = arith.constant 0 : index
    %7 = arith.index_cast %6 : i32 to index
    %c0_4 = arith.constant 0 : index
    %c0_5 = arith.constant 0 : index
    %8 = vector.load %arg3[%c0_3, %7, %c0_4, %c0_5] : memref<1x9x9x4xbf16, #tpu.memory_space<vmem>>, vector<1x8x9x4xbf16>
    %9 = vector.shape_cast %8 : vector<1x8x9x4xbf16> to vector<8x9x4xbf16>
    %c0_i32_6 = arith.constant 0 : i32
    %10 = arith.addi %1, %c0_i32_6 : i32
    %c0_7 = arith.constant 0 : index
    %11 = arith.index_cast %10 : i32 to index
    %c0_8 = arith.constant 0 : index
    %c0_9 = arith.constant 0 : index
    %12 = vector.load %arg4[%c0_7, %11, %c0_8, %c0_9] : memref<1x9x9x4xbf16, #tpu.memory_space<vmem>>, vector<1x8x9x4xbf16>
    %13 = vector.shape_cast %12 : vector<1x8x9x4xbf16> to vector<8x9x4xbf16>
    %c0_i32_10 = arith.constant 0 : i32
    %14 = arith.addi %1, %c0_i32_10 : i32
    %c0_11 = arith.constant 0 : index
    %15 = arith.index_cast %14 : i32 to index
    %c0_12 = arith.constant 0 : index
    %c0_13 = arith.constant 0 : index
    %16 = vector.load %arg5[%c0_11, %15, %c0_12, %c0_13] : memref<1x9x9x4xbf16, #tpu.memory_space<vmem>>, vector<1x8x9x4xbf16>
    %17 = vector.shape_cast %16 : vector<1x8x9x4xbf16> to vector<8x9x4xbf16>
    %c1_i32 = arith.constant 1 : i32
    %18 = arith.addi %1, %c1_i32 : i32
    %c0_14 = arith.constant 0 : index
    %19 = arith.index_cast %18 : i32 to index
    %c0_15 = arith.constant 0 : index
    %c0_16 = arith.constant 0 : index
    %20 = vector.load %arg2[%c0_14, %19, %c0_15, %c0_16] : memref<1x9x9x4xbf16, #tpu.memory_space<vmem>>, vector<1x8x9x4xbf16>
    %21 = vector.shape_cast %20 : vector<1x8x9x4xbf16> to vector<8x9x4xbf16>
    %c1_i32_17 = arith.constant 1 : i32
    %22 = arith.addi %1, %c1_i32_17 : i32
    %c0_18 = arith.constant 0 : index
    %23 = arith.index_cast %22 : i32 to index
    %c0_19 = arith.constant 0 : index
    %c0_20 = arith.constant 0 : index
    %24 = vector.load %arg3[%c0_18, %23, %c0_19, %c0_20] : memref<1x9x9x4xbf16, #tpu.memory_space<vmem>>, vector<1x8x9x4xbf16>
    %25 = vector.shape_cast %24 : vector<1x8x9x4xbf16> to vector<8x9x4xbf16>
    %26 = vector.extract_strided_slice %5 {offsets = [0, 0, 0], sizes = [8, 8, 4], strides = [1, 1, 1]} : vector<8x9x4xbf16> to vector<8x8x4xbf16>
    %27 = vector.shape_cast %26 : vector<8x8x4xbf16> to vector<64x4xbf16>
    %c0_21 = arith.constant 0 : index
    %c0_22 = arith.constant 0 : index
    %c0_23 = arith.constant 0 : index
    %28 = vector.load %arg6[%c0_21, %c0_22, %c0_23] : memref<9x4x4xbf16, #tpu.memory_space<vmem>>, vector<1x4x4xbf16>
    %29 = vector.shape_cast %28 : vector<1x4x4xbf16> to vector<4x4xbf16>
    %cst = arith.constant dense<0.000000e+00> : vector<64x4xf32>
    %30 = tpu.matmul %27, %29, %cst {dimension_numbers = #tpu.dot_dimension_numbers<[1], [0], [0], [1], [0, 0, 1, 1], [], []>} : vector<64x4xbf16>, vector<4x4xbf16>, vector<64x4xf32> -> vector<64x4xf32>
    %31 = vector.extract_strided_slice %9 {offsets = [0, 0, 0], sizes = [8, 8, 4], strides = [1, 1, 1]} : vector<8x9x4xbf16> to vector<8x8x4xbf16>
    %32 = vector.shape_cast %31 : vector<8x8x4xbf16> to vector<64x4xbf16>
    %c1 = arith.constant 1 : index
    %c0_24 = arith.constant 0 : index
    %c0_25 = arith.constant 0 : index
    %33 = vector.load %arg6[%c1, %c0_24, %c0_25] : memref<9x4x4xbf16, #tpu.memory_space<vmem>>, vector<1x4x4xbf16>
    %34 = vector.shape_cast %33 : vector<1x4x4xbf16> to vector<4x4xbf16>
    %cst_26 = arith.constant dense<0.000000e+00> : vector<64x4xf32>
    %35 = tpu.matmul %32, %34, %cst_26 {dimension_numbers = #tpu.dot_dimension_numbers<[1], [0], [0], [1], [0, 0, 1, 1], [], []>} : vector<64x4xbf16>, vector<4x4xbf16>, vector<64x4xf32> -> vector<64x4xf32>
    %36 = arith.addf %30, %35 : vector<64x4xf32>
    %37 = vector.extract_strided_slice %5 {offsets = [0, 1, 0], sizes = [8, 8, 4], strides = [1, 1, 1]} : vector<8x9x4xbf16> to vector<8x8x4xbf16>
    %38 = vector.shape_cast %37 : vector<8x8x4xbf16> to vector<64x4xbf16>
    %c2 = arith.constant 2 : index
    %c0_27 = arith.constant 0 : index
    %c0_28 = arith.constant 0 : index
    %39 = vector.load %arg6[%c2, %c0_27, %c0_28] : memref<9x4x4xbf16, #tpu.memory_space<vmem>>, vector<1x4x4xbf16>
    %40 = vector.shape_cast %39 : vector<1x4x4xbf16> to vector<4x4xbf16>
    %cst_29 = arith.constant dense<0.000000e+00> : vector<64x4xf32>
    %41 = tpu.matmul %38, %40, %cst_29 {dimension_numbers = #tpu.dot_dimension_numbers<[1], [0], [0], [1], [0, 0, 1, 1], [], []>} : vector<64x4xbf16>, vector<4x4xbf16>, vector<64x4xf32> -> vector<64x4xf32>
    %42 = arith.addf %36, %41 : vector<64x4xf32>
    %43 = vector.extract_strided_slice %13 {offsets = [0, 0, 0], sizes = [8, 8, 4], strides = [1, 1, 1]} : vector<8x9x4xbf16> to vector<8x8x4xbf16>
    %44 = vector.shape_cast %43 : vector<8x8x4xbf16> to vector<64x4xbf16>
    %c3 = arith.constant 3 : index
    %c0_30 = arith.constant 0 : index
    %c0_31 = arith.constant 0 : index
    %45 = vector.load %arg6[%c3, %c0_30, %c0_31] : memref<9x4x4xbf16, #tpu.memory_space<vmem>>, vector<1x4x4xbf16>
    %46 = vector.shape_cast %45 : vector<1x4x4xbf16> to vector<4x4xbf16>
    %cst_32 = arith.constant dense<0.000000e+00> : vector<64x4xf32>
    %47 = tpu.matmul %44, %46, %cst_32 {dimension_numbers = #tpu.dot_dimension_numbers<[1], [0], [0], [1], [0, 0, 1, 1], [], []>} : vector<64x4xbf16>, vector<4x4xbf16>, vector<64x4xf32> -> vector<64x4xf32>
    %48 = arith.addf %42, %47 : vector<64x4xf32>
    %49 = vector.extract_strided_slice %17 {offsets = [0, 0, 0], sizes = [8, 8, 4], strides = [1, 1, 1]} : vector<8x9x4xbf16> to vector<8x8x4xbf16>
    %50 = vector.shape_cast %49 : vector<8x8x4xbf16> to vector<64x4xbf16>
    %c4 = arith.constant 4 : index
    %c0_33 = arith.constant 0 : index
    %c0_34 = arith.constant 0 : index
    %51 = vector.load %arg6[%c4, %c0_33, %c0_34] : memref<9x4x4xbf16, #tpu.memory_space<vmem>>, vector<1x4x4xbf16>
    %52 = vector.shape_cast %51 : vector<1x4x4xbf16> to vector<4x4xbf16>
    %cst_35 = arith.constant dense<0.000000e+00> : vector<64x4xf32>
    %53 = tpu.matmul %50, %52, %cst_35 {dimension_numbers = #tpu.dot_dimension_numbers<[1], [0], [0], [1], [0, 0, 1, 1], [], []>} : vector<64x4xbf16>, vector<4x4xbf16>, vector<64x4xf32> -> vector<64x4xf32>
    %54 = arith.addf %48, %53 : vector<64x4xf32>
    %55 = vector.extract_strided_slice %13 {offsets = [0, 1, 0], sizes = [8, 8, 4], strides = [1, 1, 1]} : vector<8x9x4xbf16> to vector<8x8x4xbf16>
    %56 = vector.shape_cast %55 : vector<8x8x4xbf16> to vector<64x4xbf16>
    %c5 = arith.constant 5 : index
    %c0_36 = arith.constant 0 : index
    %c0_37 = arith.constant 0 : index
    %57 = vector.load %arg6[%c5, %c0_36, %c0_37] : memref<9x4x4xbf16, #tpu.memory_space<vmem>>, vector<1x4x4xbf16>
    %58 = vector.shape_cast %57 : vector<1x4x4xbf16> to vector<4x4xbf16>
    %cst_38 = arith.constant dense<0.000000e+00> : vector<64x4xf32>
    %59 = tpu.matmul %56, %58, %cst_38 {dimension_numbers = #tpu.dot_dimension_numbers<[1], [0], [0], [1], [0, 0, 1, 1], [], []>} : vector<64x4xbf16>, vector<4x4xbf16>, vector<64x4xf32> -> vector<64x4xf32>
    %60 = arith.addf %54, %59 : vector<64x4xf32>
    %61 = vector.extract_strided_slice %21 {offsets = [0, 0, 0], sizes = [8, 8, 4], strides = [1, 1, 1]} : vector<8x9x4xbf16> to vector<8x8x4xbf16>
    %62 = vector.shape_cast %61 : vector<8x8x4xbf16> to vector<64x4xbf16>
    %c6 = arith.constant 6 : index
    %c0_39 = arith.constant 0 : index
    %c0_40 = arith.constant 0 : index
    %63 = vector.load %arg6[%c6, %c0_39, %c0_40] : memref<9x4x4xbf16, #tpu.memory_space<vmem>>, vector<1x4x4xbf16>
    %64 = vector.shape_cast %63 : vector<1x4x4xbf16> to vector<4x4xbf16>
    %cst_41 = arith.constant dense<0.000000e+00> : vector<64x4xf32>
    %65 = tpu.matmul %62, %64, %cst_41 {dimension_numbers = #tpu.dot_dimension_numbers<[1], [0], [0], [1], [0, 0, 1, 1], [], []>} : vector<64x4xbf16>, vector<4x4xbf16>, vector<64x4xf32> -> vector<64x4xf32>
    %66 = arith.addf %60, %65 : vector<64x4xf32>
    %67 = vector.extract_strided_slice %25 {offsets = [0, 0, 0], sizes = [8, 8, 4], strides = [1, 1, 1]} : vector<8x9x4xbf16> to vector<8x8x4xbf16>
    %68 = vector.shape_cast %67 : vector<8x8x4xbf16> to vector<64x4xbf16>
    %c7 = arith.constant 7 : index
    %c0_42 = arith.constant 0 : index
    %c0_43 = arith.constant 0 : index
    %69 = vector.load %arg6[%c7, %c0_42, %c0_43] : memref<9x4x4xbf16, #tpu.memory_space<vmem>>, vector<1x4x4xbf16>
    %70 = vector.shape_cast %69 : vector<1x4x4xbf16> to vector<4x4xbf16>
    %cst_44 = arith.constant dense<0.000000e+00> : vector<64x4xf32>
    %71 = tpu.matmul %68, %70, %cst_44 {dimension_numbers = #tpu.dot_dimension_numbers<[1], [0], [0], [1], [0, 0, 1, 1], [], []>} : vector<64x4xbf16>, vector<4x4xbf16>, vector<64x4xf32> -> vector<64x4xf32>
    %72 = arith.addf %66, %71 : vector<64x4xf32>
    %73 = vector.extract_strided_slice %21 {offsets = [0, 1, 0], sizes = [8, 8, 4], strides = [1, 1, 1]} : vector<8x9x4xbf16> to vector<8x8x4xbf16>
    %74 = vector.shape_cast %73 : vector<8x8x4xbf16> to vector<64x4xbf16>
    %c8 = arith.constant 8 : index
    %c0_45 = arith.constant 0 : index
    %c0_46 = arith.constant 0 : index
    %75 = vector.load %arg6[%c8, %c0_45, %c0_46] : memref<9x4x4xbf16, #tpu.memory_space<vmem>>, vector<1x4x4xbf16>
    %76 = vector.shape_cast %75 : vector<1x4x4xbf16> to vector<4x4xbf16>
    %cst_47 = arith.constant dense<0.000000e+00> : vector<64x4xf32>
    %77 = tpu.matmul %74, %76, %cst_47 {dimension_numbers = #tpu.dot_dimension_numbers<[1], [0], [0], [1], [0, 0, 1, 1], [], []>} : vector<64x4xbf16>, vector<4x4xbf16>, vector<64x4xf32> -> vector<64x4xf32>
    %78 = arith.addf %72, %77 : vector<64x4xf32>
    %c0_48 = arith.constant 0 : index
    %c0_49 = arith.constant 0 : index
    %79 = vector.load %arg7[%c0_48, %c0_49] : memref<1x4xf32, #tpu.memory_space<vmem>>, vector<1x4xf32>
    %80 = vector.broadcast %79 : vector<1x4xf32> to vector<64x4xf32>
    %81 = arith.addf %78, %80 : vector<64x4xf32>
    %cst_50 = arith.constant 0.000000e+00 : f32
    %82 = vector.broadcast %cst_50 : f32 to vector<64x4xf32>
    %83 = arith.maximumf %81, %82 : vector<64x4xf32>
    %84 = vector.shape_cast %83 : vector<64x4xf32> to vector<8x8x4xf32>
    %85 = arith.truncf %84 : vector<8x8x4xf32> to vector<8x8x4xbf16>
    %c0_51 = arith.constant 0 : index
    %c0_52 = arith.constant 0 : index
    %c0_53 = arith.constant 0 : index
    %c0_54 = arith.constant 0 : index
    %86 = vector.load %arg8[%c0_51, %c0_52, %c0_53, %c0_54] : memref<1x8x8x4xbf16, #tpu.memory_space<vmem>>, vector<1x8x8x4xbf16>
    %87 = vector.shape_cast %86 : vector<1x8x8x4xbf16> to vector<8x8x4xbf16>
    %88 = vector.shape_cast %85 : vector<8x8x4xbf16> to vector<1x8x8x4xbf16>
    tpu.vector_store %arg8[%c0_51, %c0_52, %c0_53, %c0_54], %88 {strides = array<i32>} : memref<1x8x8x4xbf16, #tpu.memory_space<vmem>>, vector<1x8x8x4xbf16>,
    return
  }
  func.func @transform_0(%arg0: i32, %arg1: i32) -> (i32, i32, i32, i32) {
    %c0_i32 = arith.constant 0 : i32
    %c0_i32_0 = arith.constant 0 : i32
    %c0_i32_1 = arith.constant 0 : i32
    %c0_i32_2 = arith.constant 0 : i32
    return %arg0, %c0_i32, %c0_i32_0, %c0_i32_1 : i32, i32, i32, i32
  }
  func.func @transform_1(%arg0: i32, %arg1: i32) -> (i32, i32, i32, i32) {
    %c0_i32 = arith.constant 0 : i32
    %c0_i32_0 = arith.constant 0 : i32
    %c0_i32_1 = arith.constant 0 : i32
    %c0_i32_2 = arith.constant 0 : i32
    return %arg0, %c0_i32, %c0_i32_0, %c0_i32_1 : i32, i32, i32, i32
  }
  func.func @transform_2(%arg0: i32, %arg1: i32) -> (i32, i32, i32, i32) {
    %c0_i32 = arith.constant 0 : i32
    %c0_i32_0 = arith.constant 0 : i32
    %c0_i32_1 = arith.constant 0 : i32
    %c0_i32_2 = arith.constant 0 : i32
    return %arg0, %c0_i32, %c0_i32_0, %c0_i32_1 : i32, i32, i32, i32
  }
  func.func @transform_3(%arg0: i32, %arg1: i32) -> (i32, i32, i32, i32) {
    %c0_i32 = arith.constant 0 : i32
    %c0_i32_0 = arith.constant 0 : i32
    %c0_i32_1 = arith.constant 0 : i32
    %c0_i32_2 = arith.constant 0 : i32
    return %arg0, %c0_i32, %c0_i32_0, %c0_i32_1 : i32, i32, i32, i32
  }
  func.func @transform_4(%arg0: i32, %arg1: i32) -> (i32, i32, i32) {
    %c0_i32 = arith.constant 0 : i32
    %c0_i32_0 = arith.constant 0 : i32
    %c0_i32_1 = arith.constant 0 : i32
    %c0_i32_2 = arith.constant 0 : i32
    return %c0_i32, %c0_i32_0, %c0_i32_1 : i32, i32, i32
  }
  func.func @transform_5(%arg0: i32, %arg1: i32) -> (i32, i32) {
    %c0_i32 = arith.constant 0 : i32
    %c0_i32_0 = arith.constant 0 : i32
    %c0_i32_1 = arith.constant 0 : i32
    return %c0_i32, %c0_i32_0 : i32, i32
  }
  func.func @transform_6(%arg0: i32, %arg1: i32) -> (i32, i32, i32, i32) {
    %c0_i32 = arith.constant 0 : i32
    %c0_i32_0 = arith.constant 0 : i32
    %c0_i32_1 = arith.constant 0 : i32
    return %arg0, %arg1, %c0_i32, %c0_i32_0 : i32, i32, i32, i32
  }
}

module attributes {stable_mosaic.version = 11 : i64} {
  func.func @_conv3_proj_kernel(%arg0: i32, %arg1: i32, %arg2: memref<128x4xbf16, #tpu.memory_space<vmem>>, %arg3: memref<4x16xbf16, #tpu.memory_space<vmem>>, %arg4: memref<128x4xbf16, #tpu.memory_space<vmem>>, %arg5: memref<4x16xbf16, #tpu.memory_space<vmem>>, %arg6: memref<1x16xf32, #tpu.memory_space<vmem>>, %arg7: memref<128x16xf32, #tpu.memory_space<vmem>>) attributes {dimension_semantics = [#tpu.dimension_semantics<parallel>, #tpu.dimension_semantics<parallel>], iteration_bounds = array<i64: 1, 1>, scalar_prefetch = 0 : i64, scratch_operands = 0 : i64, tpu.core_type = #tpu.core_type<tc>, window_params = [{transform_indices = @transform_0, window_bounds = array<i64: 128, 4>}, {transform_indices = @transform_1, window_bounds = array<i64: 4, 16>}, {transform_indices = @transform_2, window_bounds = array<i64: 128, 4>}, {transform_indices = @transform_3, window_bounds = array<i64: 4, 16>}, {transform_indices = @transform_4, window_bounds = array<i64: 1, 16>}, {transform_indices = @transform_5, window_bounds = array<i64: 128, 16>}]} {
    %c0 = arith.constant 0 : index
    %c0_0 = arith.constant 0 : index
    %0 = vector.load %arg2[%c0, %c0_0] : memref<128x4xbf16, #tpu.memory_space<vmem>>, vector<128x4xbf16>
    %c0_1 = arith.constant 0 : index
    %c0_2 = arith.constant 0 : index
    %1 = vector.load %arg3[%c0_1, %c0_2] : memref<4x16xbf16, #tpu.memory_space<vmem>>, vector<4x16xbf16>
    %cst = arith.constant dense<0.000000e+00> : vector<128x16xf32>
    %2 = tpu.matmul %0, %1, %cst {dimension_numbers = #tpu.dot_dimension_numbers<[1], [0], [0], [1], [0, 0, 1, 1], [], []>} : vector<128x4xbf16>, vector<4x16xbf16>, vector<128x16xf32> -> vector<128x16xf32>
    %c0_3 = arith.constant 0 : index
    %c0_4 = arith.constant 0 : index
    %3 = vector.load %arg4[%c0_3, %c0_4] : memref<128x4xbf16, #tpu.memory_space<vmem>>, vector<128x4xbf16>
    %c0_5 = arith.constant 0 : index
    %c0_6 = arith.constant 0 : index
    %4 = vector.load %arg5[%c0_5, %c0_6] : memref<4x16xbf16, #tpu.memory_space<vmem>>, vector<4x16xbf16>
    %cst_7 = arith.constant dense<0.000000e+00> : vector<128x16xf32>
    %5 = tpu.matmul %3, %4, %cst_7 {dimension_numbers = #tpu.dot_dimension_numbers<[1], [0], [0], [1], [0, 0, 1, 1], [], []>} : vector<128x4xbf16>, vector<4x16xbf16>, vector<128x16xf32> -> vector<128x16xf32>
    %6 = arith.addf %2, %5 : vector<128x16xf32>
    %c0_8 = arith.constant 0 : index
    %c0_9 = arith.constant 0 : index
    %7 = vector.load %arg6[%c0_8, %c0_9] : memref<1x16xf32, #tpu.memory_space<vmem>>, vector<1x16xf32>
    %8 = vector.broadcast %7 : vector<1x16xf32> to vector<128x16xf32>
    %9 = arith.addf %6, %8 : vector<128x16xf32>
    %cst_10 = arith.constant 0.000000e+00 : f32
    %10 = vector.broadcast %cst_10 : f32 to vector<128x16xf32>
    %11 = arith.maximumf %9, %10 : vector<128x16xf32>
    %c0_11 = arith.constant 0 : index
    %c0_12 = arith.constant 0 : index
    %12 = vector.load %arg7[%c0_11, %c0_12] : memref<128x16xf32, #tpu.memory_space<vmem>>, vector<128x16xf32>
    tpu.vector_store %arg7[%c0_11, %c0_12], %11 {strides = array<i32>} : memref<128x16xf32, #tpu.memory_space<vmem>>, vector<128x16xf32>,
    return
  }
  func.func @transform_0(%arg0: i32, %arg1: i32) -> (i32, i32) {
    %c0_i32 = arith.constant 0 : i32
    %c0_i32_0 = arith.constant 0 : i32
    return %arg0, %c0_i32 : i32, i32
  }
  func.func @transform_1(%arg0: i32, %arg1: i32) -> (i32, i32) {
    %c0_i32 = arith.constant 0 : i32
    %c0_i32_0 = arith.constant 0 : i32
    return %c0_i32, %arg1 : i32, i32
  }
  func.func @transform_2(%arg0: i32, %arg1: i32) -> (i32, i32) {
    %c0_i32 = arith.constant 0 : i32
    %c0_i32_0 = arith.constant 0 : i32
    return %arg0, %c0_i32 : i32, i32
  }
  func.func @transform_3(%arg0: i32, %arg1: i32) -> (i32, i32) {
    %c0_i32 = arith.constant 0 : i32
    %c0_i32_0 = arith.constant 0 : i32
    return %c0_i32, %arg1 : i32, i32
  }
  func.func @transform_4(%arg0: i32, %arg1: i32) -> (i32, i32) {
    %c0_i32 = arith.constant 0 : i32
    %c0_i32_0 = arith.constant 0 : i32
    return %c0_i32, %arg1 : i32, i32
  }
  func.func @transform_5(%arg0: i32, %arg1: i32) -> (i32, i32) {
    %c0_i32 = arith.constant 0 : i32
    return %arg0, %arg1 : i32, i32
  }
}

</mosaic_0001>

<bundles_post_ra>
// kernel: bottleneck_forward.5
= control target key start
LH: loop header
LB: loop body
LE: loop exit
PB: predicated region body
PF: predicated region fallthrough
CT: control target
= control target key end

     0   :  { %vm121_vm0 = vcmask 1041408   ;;  %vm96_vm1 = vcmask 31744   ;;  %s632_s0 = inlined_call_operand.vmem [shape: bf16[128,4], index: 0, kind: input, shape index: {}]   ;;  %s633_s1 = inlined_call_operand.vmem [shape: bf16[4,16], index: 1, kind: input, shape index: {}]   ;;  %s634_s2 = inlined_call_operand.vmem [shape: bf16[128,4], index: 2, kind: input, shape index: {}]   ;;  %s635_s3 = inlined_call_operand.vmem [shape: bf16[4,16], index: 3, kind: input, shape index: {}]   ;;  %s636_s4 = inlined_call_operand.vmem [shape: f32[1,16], index: 4, kind: input, shape index: {}]   ;;  %s637_s5 = inlined_call_operand.hbm [shape: f32[128,16], index: 5, kind: output, shape index: {}]  }
   0x1   :  { %v55_v0 = vld [vmem:[%s635_s3] sm:$0x3] }
   0x2   :  { %v38_v1 = vld [vmem:[%s633_s1] sm:$0x3]  ;;  %v123_v2 = vsel %vm121_vm0, %v55_v0, 0 }
   0x3   :  { %v239_v3 = vsel %vm121_vm0, %v38_v1, 0  ;;  %v449_v4 = vld [vmem:[%s634_s2] sm:$0xff]  ;;  %132 = vmatpush.bf16.msra.mxu0 %v123_v2  ;;  %457 = vmatpush.bf16.msra.mxu2 %v123_v2 }
   0x4   :  { %v453_v5 = vld [vmem:[%s634_s2 + $0x20] sm:$0xff]  ;;  %248 = vmatpush.bf16.msra.mxu1 %v239_v3  ;;  %458 = vmatpush.bf16.msra.mxu3 %v239_v3 }
   0x5   :  { %v441_v6 = vld [vmem:[%s632_s0] sm:$0xff] }
   0x6   :  { %v445_v7 = vld [vmem:[%s632_s0 + $0x20] sm:$0xff]  ;;  %393 = vmatmul.msk.bf16.vlgmr.msra.gmra.mxu0 %vm96_vm1, %v449_v4  ;;  %397 = vmatmul.msk.bf16.vlgmr.msra.gmra.mxu2 %vm96_vm1, %v453_v5 }
   0x7   :  { %10 = vsyncpa [#allocation3], 0  ;;  %433 = vmatmul.msk.bf16.vlgmr.msra.gmra.mxu1 %vm96_vm1, %v441_v6  ;;  %437 = vmatmul.msk.bf16.vlgmr.msra.gmra.mxu3 %vm96_vm1, %v445_v7  ;;  %v450_v8 = vld [vmem:[%s634_s2 + $0x8] sm:$0xff]  ;;  %v451_v12 = vld [vmem:[%s634_s2 + $0x10] sm:$0xff]  ;;  %vm326_vm2 = vcmask 130048   ;;  %s349_s1 = sshll.u32 %s637_s5, 4  ;;  %s350_s1 = int_to_ptr.hbm [resolvable:$true] %s349_s1 }
   0x8   :  { %v454_v9 = vld [vmem:[%s634_s2 + $0x28] sm:$0xff]  ;;  %v455_v13 = vld [vmem:[%s634_s2 + $0x30] sm:$0xff]  ;;  %v452_v16 = vld [vmem:[%s634_s2 + $0x18] sm:$0xff]  ;;  %s490_s29 = smov 128   ;;  %s491_s30 = smov 8  }
   0x9   :  { %v442_v10 = vld [vmem:[%s632_s0 + $0x8] sm:$0xff]  ;;  %v443_v14 = vld [vmem:[%s632_s0 + $0x10] sm:$0xff]  ;;  %v456_v17 = vld [vmem:[%s634_s2 + $0x38] sm:$0xff] }
   0xa   :  { %v446_v11 = vld [vmem:[%s632_s0 + $0x28] sm:$0xff]  ;;  %v447_v15 = vld [vmem:[%s632_s0 + $0x30] sm:$0xff]  ;;  %v444_v18 = vld [vmem:[%s632_s0 + $0x18] sm:$0xff] }
   0xb   :  { %v448_v19 = vld [vmem:[%s632_s0 + $0x38] sm:$0xff]  ;;  %v595_v21 = vld [vmem:[%s636_s4] ss:$0 sm:$0xff]  ;;  %s489_s0 = smov [#allocation2]  }
   0xc   :  { %s347_s2 = sshll.u32 %s489_s0, 4  ;;  %s348_s2 = int_to_ptr.vmem [resolvable:$true] %s347_s2 }
  0x16   :  { %394 = vmatmul.msk.bf16.gmra.mxu0 %vm96_vm1, %v450_v8  ;;  %398 = vmatmul.msk.bf16.gmra.mxu2 %vm96_vm1, %v454_v9 }
  0x17   :  { %434 = vmatmul.msk.bf16.gmra.mxu1 %vm96_vm1, %v442_v10  ;;  %438 = vmatmul.msk.bf16.gmra.mxu3 %vm96_vm1, %v446_v11 }
  0x26   :  { %395 = vmatmul.msk.bf16.gmra.mxu0 %vm96_vm1, %v451_v12  ;;  %399 = vmatmul.msk.bf16.gmra.mxu2 %vm96_vm1, %v455_v13 }
  0x27   :  { %435 = vmatmul.msk.bf16.gmra.mxu1 %vm96_vm1, %v443_v14  ;;  %439 = vmatmul.msk.bf16.gmra.mxu3 %vm96_vm1, %v447_v15 }
  0x36   :  { %396 = vmatmul.msk.bf16.gmra.mxu0 %vm96_vm1, %v452_v16  ;;  %400 = vmatmul.msk.bf16.gmra.mxu2 %vm96_vm1, %v456_v17 }
  0x37   :  { %436 = vmatmul.msk.bf16.gmra.mxu1 %vm96_vm1, %v444_v18  ;;  %440 = vmatmul.msk.bf16.gmra.mxu3 %vm96_vm1, %v448_v19 }
  0x83   :  { %v134_v20 = vpop.f32.mrf.mxu0 }
  0x84   :  { %v250_v22 = vpop.f32.mrf.mxu1 }
  0x85   :  { %v251_v23 = vadd.f32 %v250_v22, %v134_v20 }
  0x87   :  { %v294_v24 = vadd.f32 %v595_v21, %v251_v23 }
  0x89   :  { %v310_v25 = vmax.f32 %v294_v24, 0.0  ;;  %v154_v26 = vpop.f32.mrf.mxu2 }
  0x8a   :  { %v270_v27 = vpop.f32.mrf.mxu3 }
  0x8b   :  { %327 = vst.msk [vmem:[#allocation2] sm:$0xff] %vm326_vm2, %v310_v25  ;;  %v271_v28 = vadd.f32 %v270_v27, %v154_v26  ;;  %v136_v29 = vpop.f32.mrf.mxu0 }
  0x8c   :  { %v252_v30 = vpop.f32.mrf.mxu1 }
  0x8d   :  { %v302_v31 = vadd.f32 %v595_v21, %v271_v28  ;;  %v253_v32 = vadd.f32 %v252_v30, %v136_v29 }
  0x8f   :  { %v318_v33 = vmax.f32 %v302_v31, 0.0  ;;  %v295_v34 = vadd.f32 %v595_v21, %v253_v32 }
  0x91   :  { %335 = vst.msk [vmem:[#allocation2 + $0x40] sm:$0xff] %vm326_vm2, %v318_v33  ;;  %v311_v35 = vmax.f32 %v295_v34, 0.0  ;;  %v156_v36 = vpop.f32.mrf.mxu2 }
  0x92   :  { %v272_v37 = vpop.f32.mrf.mxu3 }
  0x93   :  { %328 = vst.msk [vmem:[#allocation2 + $0x8] sm:$0xff] %vm326_vm2, %v311_v35  ;;  %v273_v38 = vadd.f32 %v272_v37, %v156_v36  ;;  %v139_v39 = vpop.f32.mrf.mxu0 }
  0x94   :  { %v255_v40 = vpop.f32.mrf.mxu1 }
  0x95   :  { %v303_v41 = vadd.f32 %v595_v21, %v273_v38  ;;  %v256_v42 = vadd.f32 %v255_v40, %v139_v39 }
  0x97   :  { %v319_v43 = vmax.f32 %v303_v41, 0.0  ;;  %v296_v44 = vadd.f32 %v595_v21, %v256_v42 }
  0x99   :  { %336 = vst.msk [vmem:[#allocation2 + $0x48] sm:$0xff] %vm326_vm2, %v319_v43  ;;  %v312_v45 = vmax.f32 %v296_v44, 0.0  ;;  %v159_v46 = vpop.f32.mrf.mxu2 }
  0x9a   :  { %v275_v47 = vpop.f32.mrf.mxu3 }
  0x9b   :  { %329 = vst.msk [vmem:[#allocation2 + $0x10] sm:$0xff] %vm326_vm2, %v312_v45  ;;  %v276_v48 = vadd.f32 %v275_v47, %v159_v46  ;;  %v141_v49 = vpop.f32.mrf.mxu0 }
  0x9c   :  { %v257_v50 = vpop.f32.mrf.mxu1 }
  0x9d   :  { %v304_v51 = vadd.f32 %v595_v21, %v276_v48  ;;  %v258_v52 = vadd.f32 %v257_v50, %v141_v49 }
  0x9f   :  { %v320_v53 = vmax.f32 %v304_v51, 0.0  ;;  %v297_v54 = vadd.f32 %v595_v21, %v258_v52 }
  0xa1   :  { %337 = vst.msk [vmem:[#allocation2 + $0x50] sm:$0xff] %vm326_vm2, %v320_v53  ;;  %v313_v55 = vmax.f32 %v297_v54, 0.0  ;;  %v161_v56 = vpop.f32.mrf.mxu2 }
  0xa2   :  { %v277_v57 = vpop.f32.mrf.mxu3 }
  0xa3   :  { %330 = vst.msk [vmem:[#allocation2 + $0x18] sm:$0xff] %vm326_vm2, %v313_v55  ;;  %v278_v58 = vadd.f32 %v277_v57, %v161_v56  ;;  %v144_v59 = vpop.f32.mrf.mxu0 }
  0xa4   :  { %v260_v60 = vpop.f32.mrf.mxu1 }
  0xa5   :  { %v305_v61 = vadd.f32 %v595_v21, %v278_v58  ;;  %v261_v62 = vadd.f32 %v260_v60, %v144_v59 }
  0xa7   :  { %v321_v63 = vmax.f32 %v305_v61, 0.0  ;;  %v298_v0 = vadd.f32 %v595_v21, %v261_v62 }
  0xa9   :  { %338 = vst.msk [vmem:[#allocation2 + $0x58] sm:$0xff] %vm326_vm2, %v321_v63  ;;  %v314_v1 = vmax.f32 %v298_v0, 0.0  ;;  %v164_v2 = vpop.f32.mrf.mxu2 }
  0xaa   :  { %v280_v3 = vpop.f32.mrf.mxu3 }
  0xab   :  { %331 = vst.msk [vmem:[#allocation2 + $0x20] sm:$0xff] %vm326_vm2, %v314_v1  ;;  %v281_v4 = vadd.f32 %v280_v3, %v164_v2  ;;  %v146_v5 = vpop.f32.mrf.mxu0 }
  0xac   :  { %v262_v6 = vpop.f32.mrf.mxu1 }
  0xad   :  { %v306_v7 = vadd.f32 %v595_v21, %v281_v4  ;;  %v263_v8 = vadd.f32 %v262_v6, %v146_v5 }
  0xaf   :  { %v322_v9 = vmax.f32 %v306_v7, 0.0  ;;  %v299_v10 = vadd.f32 %v595_v21, %v263_v8 }
  0xb1   :  { %339 = vst.msk [vmem:[#allocation2 + $0x60] sm:$0xff] %vm326_vm2, %v322_v9  ;;  %v315_v11 = vmax.f32 %v299_v10, 0.0  ;;  %v166_v12 = vpop.f32.mrf.mxu2 }
  0xb2   :  { %v282_v13 = vpop.f32.mrf.mxu3 }
  0xb3   :  { %332 = vst.msk [vmem:[#allocation2 + $0x28] sm:$0xff] %vm326_vm2, %v315_v11  ;;  %v283_v14 = vadd.f32 %v282_v13, %v166_v12  ;;  %v149_v15 = vpop.f32.mrf.mxu0 }
  0xb4   :  { %v265_v16 = vpop.f32.mrf.mxu1 }
  0xb5   :  { %v307_v17 = vadd.f32 %v595_v21, %v283_v14  ;;  %v266_v18 = vadd.f32 %v265_v16, %v149_v15 }
  0xb7   :  { %v323_v19 = vmax.f32 %v307_v17, 0.0  ;;  %v300_v20 = vadd.f32 %v595_v21, %v266_v18 }
  0xb9   :  { %340 = vst.msk [vmem:[#allocation2 + $0x68] sm:$0xff] %vm326_vm2, %v323_v19  ;;  %v316_v22 = vmax.f32 %v300_v20, 0.0  ;;  %v169_v23 = vpop.f32.mrf.mxu2 }
  0xba   :  { %v285_v24 = vpop.f32.mrf.mxu3 }
  0xbb   :  { %333 = vst.msk [vmem:[#allocation2 + $0x30] sm:$0xff] %vm326_vm2, %v316_v22  ;;  %v286_v25 = vadd.f32 %v285_v24, %v169_v23  ;;  %v151_v26 = vpop.f32.mrf.mxu0 }
  0xbc   :  { %v267_v27 = vpop.f32.mrf.mxu1 }
  0xbd   :  { %v308_v28 = vadd.f32 %v595_v21, %v286_v25  ;;  %v268_v29 = vadd.f32 %v267_v27, %v151_v26 }
  0xbf   :  { %v324_v30 = vmax.f32 %v308_v28, 0.0  ;;  %v301_v31 = vadd.f32 %v595_v21, %v268_v29 }
  0xc1   :  { %341 = vst.msk [vmem:[#allocation2 + $0x70] sm:$0xff] %vm326_vm2, %v324_v30  ;;  %v317_v32 = vmax.f32 %v301_v31, 0.0  ;;  %v171_v33 = vpop.f32.mrf.mxu2 }
  0xc2   :  { %v287_v34 = vpop.f32.mrf.mxu3 }
  0xc3   :  { %334 = vst.msk [vmem:[#allocation2 + $0x38] sm:$0xff] %vm326_vm2, %v317_v32  ;;  %v288_v35 = vadd.f32 %v287_v34, %v171_v33 }
  0xc5   :  { %v309_v36 = vadd.f32 %v595_v21, %v288_v35 }
  0xc7   :  { %v325_v37 = vmax.f32 %v309_v36, 0.0 }
  0xc9   :  { %342 = vst.msk [vmem:[#allocation2 + $0x78] sm:$0xff] %vm326_vm2, %v325_v37 }
  0xca   :  { %355 = dma.vmem_to_hbm [thread:$0]  %s348_s2, 2048, %s350_s1, [#allocation3], %s490_s29, %s490_s29, %s491_s30  }
  0xcb   :  { %487 = dma.done.wait [#allocation3], 2048  }
  0xcc   :  { %488 = vsyncadd [#allocation3], 4294965248 }
  0xcd   :  { %360 = vsyncpa [#allocation3], 1 }

// kernel: bottleneck_forward.3
= control target key start
LH: loop header
LB: loop body
LE: loop exit
PB: predicated region body
PF: predicated region fallthrough
CT: control target
= control target key end

     0   :  { %vm470_vm0 = vcmask 1041408   ;;  %vm19_vm1 = vcmask 31744   ;;  %v1301_v26 = vmov 0.0   ;;  %vm1034_vm2 = vcmask 27648   ;;  %s1998_s1 = inlined_call_operand.vmem [shape: bf16[4,4], index: 1, kind: input, shape index: {}]   ;;  %s1999_s0 = inlined_call_operand.vmem [shape: bf16[512,4], index: 0, kind: input, shape index: {}]   ;;  %s2000_s2 = inlined_call_operand.vmem [shape: f32[1,4], index: 2, kind: input, shape index: {}]   ;;  %s2001_s3 = inlined_call_operand.vmem [shape: bf16[512,4], index: 3, kind: output, shape index: {}]  }
   0x1   :  { %v212_v0 = vld [vmem:[%s1998_s1] sm:$0x3]  ;;  %v1264_v6 = vld [vmem:[%s1999_s0 + $0x8] sm:$0xff]  ;;  %v1265_v10 = vld [vmem:[%s1999_s0 + $0x10] sm:$0xff]  ;;  %20 = vst.msk [vmem:[#allocation2] sm:$0xff] %vm19_vm1, %v1301_v26 }
   0x2   :  { %v472_v1 = vsel %vm470_vm0, %v212_v0, 0  ;;  %v1263_v2 = vld [vmem:[%s1999_s0] sm:$0xff]  ;;  %v1272_v7 = vld [vmem:[%s1999_s0 + $0x48] sm:$0xff]  ;;  %v1273_v11 = vld [vmem:[%s1999_s0 + $0x50] sm:$0xff]  ;;  %21 = vst.msk [vmem:[#allocation2 + $0x8] sm:$0xff] %vm19_vm1, %v1301_v26 }
   0x3   :  { %v1271_v3 = vld [vmem:[%s1999_s0 + $0x40] sm:$0xff]  ;;  %481 = vmatpush.bf16.msra.mxu0 %v472_v1  ;;  %1295 = vmatpush.bf16.msra.mxu1 %v472_v1  ;;  %v1280_v8 = vld [vmem:[%s1999_s0 + $0x88] sm:$0xff]  ;;  %v1281_v12 = vld [vmem:[%s1999_s0 + $0x90] sm:$0xff]  ;;  %22 = vst.msk [vmem:[#allocation2 + $0x10] sm:$0xff] %vm19_vm1, %v1301_v26 }
   0x4   :  { %v1279_v4 = vld [vmem:[%s1999_s0 + $0x80] sm:$0xff]  ;;  %1296 = vmatpush.bf16.msra.mxu2 %v472_v1  ;;  %1297 = vmatpush.bf16.msra.mxu3 %v472_v1  ;;  %v1288_v9 = vld [vmem:[%s1999_s0 + $0xc8] sm:$0xff]  ;;  %v1289_v13 = vld [vmem:[%s1999_s0 + $0xd0] sm:$0xff]  ;;  %23 = vst.msk [vmem:[#allocation2 + $0x18] sm:$0xff] %vm19_vm1, %v1301_v26 }
   0x5   :  { %v1287_v5 = vld [vmem:[%s1999_s0 + $0xc0] sm:$0xff]  ;;  %v1266_v14 = vld [vmem:[%s1999_s0 + $0x18] sm:$0xff]  ;;  %v1268_v22 = vld [vmem:[%s1999_s0 + $0x28] sm:$0xff]  ;;  %24 = vst.msk [vmem:[#allocation2 + $0x20] sm:$0xff] %vm19_vm1, %v1301_v26 }
   0x6   :  { %1231 = vmatmul.msk.bf16.vlgmr.msra.gmra.mxu0 %vm19_vm1, %v1263_v2  ;;  %1239 = vmatmul.msk.bf16.vlgmr.msra.gmra.mxu1 %vm19_vm1, %v1271_v3  ;;  %v1274_v15 = vld [vmem:[%s1999_s0 + $0x58] sm:$0xff]  ;;  %v1267_v18 = vld [vmem:[%s1999_s0 + $0x20] sm:$0xff]  ;;  %v1276_v23 = vld [vmem:[%s1999_s0 + $0x68] sm:$0xff]  ;;  %25 = vst.msk [vmem:[#allocation2 + $0x28] sm:$0xff] %vm19_vm1, %v1301_v26 }
   0x7   :  { %1247 = vmatmul.msk.bf16.vlgmr.msra.gmra.mxu2 %vm19_vm1, %v1279_v4  ;;  %1255 = vmatmul.msk.bf16.vlgmr.msra.gmra.mxu3 %vm19_vm1, %v1287_v5  ;;  %v1282_v16 = vld [vmem:[%s1999_s0 + $0x98] sm:$0xff]  ;;  %v1275_v19 = vld [vmem:[%s1999_s0 + $0x60] sm:$0xff]  ;;  %v1284_v24 = vld [vmem:[%s1999_s0 + $0xa8] sm:$0xff]  ;;  %26 = vst.msk [vmem:[#allocation2 + $0x30] sm:$0xff] %vm19_vm1, %v1301_v26 }
   0x8   :  { %v1290_v17 = vld [vmem:[%s1999_s0 + $0xd8] sm:$0xff]  ;;  %v1283_v20 = vld [vmem:[%s1999_s0 + $0xa0] sm:$0xff]  ;;  %v1292_v25 = vld [vmem:[%s1999_s0 + $0xe8] sm:$0xff]  ;;  %27 = vst.msk [vmem:[#allocation2 + $0x38] sm:$0xff] %vm19_vm1, %v1301_v26 }
   0x9   :  { %v1291_v21 = vld [vmem:[%s1999_s0 + $0xe0] sm:$0xff]  ;;  %28 = vst.msk [vmem:[#allocation2 + $0x40] sm:$0xff] %vm19_vm1, %v1301_v26  ;;  %v1269_v27 = vld [vmem:[%s1999_s0 + $0x30] sm:$0xff]  ;;  %v1270_v31 = vld [vmem:[%s1999_s0 + $0x38] sm:$0xff] }
   0xa   :  { %29 = vst.msk [vmem:[#allocation2 + $0x48] sm:$0xff] %vm19_vm1, %v1301_v26  ;;  %v1277_v28 = vld [vmem:[%s1999_s0 + $0x70] sm:$0xff]  ;;  %v1278_v32 = vld [vmem:[%s1999_s0 + $0x78] sm:$0xff]  ;;  %v84_v35 = vld [vmem:[#allocation2] sm:$0xff] }
   0xb   :  { %30 = vst.msk [vmem:[#allocation2 + $0x50] sm:$0xff] %vm19_vm1, %v1301_v26  ;;  %v1285_v29 = vld [vmem:[%s1999_s0 + $0xb0] sm:$0xff]  ;;  %v1286_v33 = vld [vmem:[%s1999_s0 + $0xb8] sm:$0xff]  ;;  %v1555_v39 = vld [vmem:[%s2000_s2] ss:$0 sm:$0xff] }
   0xc   :  { %v1293_v30 = vld [vmem:[%s1999_s0 + $0xf0] sm:$0xff]  ;;  %31 = vst.msk [vmem:[#allocation2 + $0x58] sm:$0xff] %vm19_vm1, %v1301_v26  ;;  %v1294_v34 = vld [vmem:[%s1999_s0 + $0xf8] sm:$0xff]  ;;  %v85_v56 = vld [vmem:[#allocation2 + $0x8] sm:$0xff] }
   0xd   :  { %32 = vst.msk [vmem:[#allocation2 + $0x60] sm:$0xff] %vm19_vm1, %v1301_v26  ;;  %v86_v0 = vld [vmem:[#allocation2 + $0x10] sm:$0xff] }
   0xe   :  { %33 = vst.msk [vmem:[#allocation2 + $0x68] sm:$0xff] %vm19_vm1, %v1301_v26 }
   0xf   :  { %34 = vst.msk [vmem:[#allocation2 + $0x70] sm:$0xff] %vm19_vm1, %v1301_v26 }
  0x10   :  { %35 = vst.msk [vmem:[#allocation2 + $0x78] sm:$0xff] %vm19_vm1, %v1301_v26 }
  0x11   :  { %36 = vst.msk [vmem:[#allocation2 + $0x80] sm:$0xff] %vm19_vm1, %v1301_v26 }
  0x12   :  { %37 = vst.msk [vmem:[#allocation2 + $0x88] sm:$0xff] %vm19_vm1, %v1301_v26 }
  0x13   :  { %38 = vst.msk [vmem:[#allocation2 + $0x90] sm:$0xff] %vm19_vm1, %v1301_v26 }
  0x14   :  { %39 = vst.msk [vmem:[#allocation2 + $0x98] sm:$0xff] %vm19_vm1, %v1301_v26 }
  0x15   :  { %40 = vst.msk [vmem:[#allocation2 + $0xa0] sm:$0xff] %vm19_vm1, %v1301_v26 }
  0x16   :  { %1232 = vmatmul.msk.bf16.gmra.mxu0 %vm19_vm1, %v1264_v6  ;;  %1240 = vmatmul.msk.bf16.gmra.mxu1 %vm19_vm1, %v1272_v7  ;;  %41 = vst.msk [vmem:[#allocation2 + $0xa8] sm:$0xff] %vm19_vm1, %v1301_v26 }
  0x17   :  { %1248 = vmatmul.msk.bf16.gmra.mxu2 %vm19_vm1, %v1280_v8  ;;  %1256 = vmatmul.msk.bf16.gmra.mxu3 %vm19_vm1, %v1288_v9  ;;  %42 = vst.msk [vmem:[#allocation2 + $0xb0] sm:$0xff] %vm19_vm1, %v1301_v26 }
  0x18   :  { %43 = vst.msk [vmem:[#allocation2 + $0xb8] sm:$0xff] %vm19_vm1, %v1301_v26  ;;  %v100_v50 = vld [vmem:[#allocation2 + $0x80] sm:$0xff] }
  0x19   :  { %44 = vst.msk [vmem:[#allocation2 + $0xc0] sm:$0xff] %vm19_vm1, %v1301_v26  ;;  %v101_v58 = vld [vmem:[#allocation2 + $0x88] sm:$0xff] }
  0x1a   :  { %45 = vst.msk [vmem:[#allocation2 + $0xc8] sm:$0xff] %vm19_vm1, %v1301_v26  ;;  %v102_v4 = vld [vmem:[#allocation2 + $0x90] sm:$0xff] }
  0x1b   :  { %46 = vst.msk [vmem:[#allocation2 + $0xd0] sm:$0xff] %vm19_vm1, %v1301_v26 }
  0x1c   :  { %47 = vst.msk [vmem:[#allocation2 + $0xd8] sm:$0xff] %vm19_vm1, %v1301_v26 }
  0x1d   :  { %48 = vst.msk [vmem:[#allocation2 + $0xe0] sm:$0xff] %vm19_vm1, %v1301_v26 }
  0x1e   :  { %49 = vst.msk [vmem:[#allocation2 + $0xe8] sm:$0xff] %vm19_vm1, %v1301_v26 }
  0x1f   :  { %50 = vst.msk [vmem:[#allocation2 + $0xf0] sm:$0xff] %vm19_vm1, %v1301_v26 }
  0x20   :  { %51 = vst.msk [vmem:[#allocation2 + $0xf8] sm:$0xff] %vm19_vm1, %v1301_v26 }
  0x21   :  { %52 = vst.msk [vmem:[#allocation2 + $0x100] sm:$0xff] %vm19_vm1, %v1301_v26 }
  0x22   :  { %53 = vst.msk [vmem:[#allocation2 + $0x108] sm:$0xff] %vm19_vm1, %v1301_v26 }
  0x23   :  { %54 = vst.msk [vmem:[#allocation2 + $0x110] sm:$0xff] %vm19_vm1, %v1301_v26 }
  0x24   :  { %55 = vst.msk [vmem:[#allocation2 + $0x118] sm:$0xff] %vm19_vm1, %v1301_v26 }
  0x25   :  { %56 = vst.msk [vmem:[#allocation2 + $0x120] sm:$0xff] %vm19_vm1, %v1301_v26 }
  0x26   :  { %1233 = vmatmul.msk.bf16.gmra.mxu0 %vm19_vm1, %v1265_v10  ;;  %1241 = vmatmul.msk.bf16.gmra.mxu1 %vm19_vm1, %v1273_v11  ;;  %57 = vst.msk [vmem:[#allocation2 + $0x128] sm:$0xff] %vm19_vm1, %v1301_v26 }
  0x27   :  { %1249 = vmatmul.msk.bf16.gmra.mxu2 %vm19_vm1, %v1281_v12  ;;  %1257 = vmatmul.msk.bf16.gmra.mxu3 %vm19_vm1, %v1289_v13  ;;  %58 = vst.msk [vmem:[#allocation2 + $0x130] sm:$0xff] %vm19_vm1, %v1301_v26  ;;  %v87_v12 = vld [vmem:[#allocation2 + $0x18] sm:$0xff] }
  0x28   :  { %59 = vst.msk [vmem:[#allocation2 + $0x138] sm:$0xff] %vm19_vm1, %v1301_v26  ;;  %v116_v53 = vld [vmem:[#allocation2 + $0x100] sm:$0xff] }
  0x29   :  { %60 = vst.msk [vmem:[#allocation2 + $0x140] sm:$0xff] %vm19_vm1, %v1301_v26  ;;  %v117_v60 = vld [vmem:[#allocation2 + $0x108] sm:$0xff] }
  0x2a   :  { %61 = vst.msk [vmem:[#allocation2 + $0x148] sm:$0xff] %vm19_vm1, %v1301_v26  ;;  %v118_v8 = vld [vmem:[#allocation2 + $0x110] sm:$0xff] }
  0x2b   :  { %62 = vst.msk [vmem:[#allocation2 + $0x150] sm:$0xff] %vm19_vm1, %v1301_v26 }
  0x2c   :  { %63 = vst.msk [vmem:[#allocation2 + $0x158] sm:$0xff] %vm19_vm1, %v1301_v26 }
  0x2d   :  { %64 = vst.msk [vmem:[#allocation2 + $0x160] sm:$0xff] %vm19_vm1, %v1301_v26 }
  0x2e   :  { %65 = vst.msk [vmem:[#allocation2 + $0x168] sm:$0xff] %vm19_vm1, %v1301_v26 }
  0x2f   :  { %66 = vst.msk [vmem:[#allocation2 + $0x170] sm:$0xff] %vm19_vm1, %v1301_v26 }
  0x30   :  { %67 = vst.msk [vmem:[#allocation2 + $0x178] sm:$0xff] %vm19_vm1, %v1301_v26 }
  0x31   :  { %68 = vst.msk [vmem:[#allocation2 + $0x180] sm:$0xff] %vm19_vm1, %v1301_v26 }
  0x32   :  { %69 = vst.msk [vmem:[#allocation2 + $0x188] sm:$0xff] %vm19_vm1, %v1301_v26 }
  0x33   :  { %70 = vst.msk [vmem:[#allocation2 + $0x190] sm:$0xff] %vm19_vm1, %v1301_v26 }
  0x34   :  { %71 = vst.msk [vmem:[#allocation2 + $0x198] sm:$0xff] %vm19_vm1, %v1301_v26 }
  0x35   :  { %72 = vst.msk [vmem:[#allocation2 + $0x1a0] sm:$0xff] %vm19_vm1, %v1301_v26 }
  0x36   :  { %1234 = vmatmul.msk.bf16.gmra.mxu0 %vm19_vm1, %v1266_v14  ;;  %1242 = vmatmul.msk.bf16.gmra.mxu1 %vm19_vm1, %v1274_v15  ;;  %73 = vst.msk [vmem:[#allocation2 + $0x1a8] sm:$0xff] %vm19_vm1, %v1301_v26  ;;  %v103_v14 = vld [vmem:[#allocation2 + $0x98] sm:$0xff] }
  0x37   :  { %1250 = vmatmul.msk.bf16.gmra.mxu2 %vm19_vm1, %v1282_v16  ;;  %1258 = vmatmul.msk.bf16.gmra.mxu3 %vm19_vm1, %v1290_v17  ;;  %74 = vst.msk [vmem:[#allocation2 + $0x1b0] sm:$0xff] %vm19_vm1, %v1301_v26  ;;  %v119_v16 = vld [vmem:[#allocation2 + $0x118] sm:$0xff] }
  0x38   :  { %75 = vst.msk [vmem:[#allocation2 + $0x1b8] sm:$0xff] %vm19_vm1, %v1301_v26  ;;  %v132_v54 = vld [vmem:[#allocation2 + $0x180] sm:$0xff] }
  0x39   :  { %76 = vst.msk [vmem:[#allocation2 + $0x1c0] sm:$0xff] %vm19_vm1, %v1301_v26  ;;  %v133_v62 = vld [vmem:[#allocation2 + $0x188] sm:$0xff] }
  0x3a   :  { %77 = vst.msk [vmem:[#allocation2 + $0x1c8] sm:$0xff] %vm19_vm1, %v1301_v26  ;;  %v134_v10 = vld [vmem:[#allocation2 + $0x190] sm:$0xff] }
  0x3b   :  { %78 = vst.msk [vmem:[#allocation2 + $0x1d0] sm:$0xff] %vm19_vm1, %v1301_v26 }
  0x3c   :  { %79 = vst.msk [vmem:[#allocation2 + $0x1d8] sm:$0xff] %vm19_vm1, %v1301_v26 }
  0x3d   :  { %80 = vst.msk [vmem:[#allocation2 + $0x1e0] sm:$0xff] %vm19_vm1, %v1301_v26 }
  0x3e   :  { %81 = vst.msk [vmem:[#allocation2 + $0x1e8] sm:$0xff] %vm19_vm1, %v1301_v26 }
  0x3f   :  { %82 = vst.msk [vmem:[#allocation2 + $0x1f0] sm:$0xff] %vm19_vm1, %v1301_v26 }
  0x40   :  { %83 = vst.msk [vmem:[#allocation2 + $0x1f8] sm:$0xff] %vm19_vm1, %v1301_v26 }
  0x46   :  { %1235 = vmatmul.msk.bf16.gmra.mxu0 %vm19_vm1, %v1267_v18  ;;  %1243 = vmatmul.msk.bf16.gmra.mxu1 %vm19_vm1, %v1275_v19 }
  0x47   :  { %1251 = vmatmul.msk.bf16.gmra.mxu2 %vm19_vm1, %v1283_v20  ;;  %1259 = vmatmul.msk.bf16.gmra.mxu3 %vm19_vm1, %v1291_v21 }
  0x56   :  { %1236 = vmatmul.msk.bf16.gmra.mxu0 %vm19_vm1, %v1268_v22  ;;  %1244 = vmatmul.msk.bf16.gmra.mxu1 %vm19_vm1, %v1276_v23 }
  0x57   :  { %1252 = vmatmul.msk.bf16.gmra.mxu2 %vm19_vm1, %v1284_v24  ;;  %1260 = vmatmul.msk.bf16.gmra.mxu3 %vm19_vm1, %v1292_v25 }
  0x66   :  { %1237 = vmatmul.msk.bf16.gmra.mxu0 %vm19_vm1, %v1269_v27  ;;  %1245 = vmatmul.msk.bf16.gmra.mxu1 %vm19_vm1, %v1277_v28 }
  0x67   :  { %1253 = vmatmul.msk.bf16.gmra.mxu2 %vm19_vm1, %v1285_v29  ;;  %1261 = vmatmul.msk.bf16.gmra.mxu3 %vm19_vm1, %v1293_v30 }
  0x76   :  { %1238 = vmatmul.msk.bf16.gmra.mxu0 %vm19_vm1, %v1270_v31  ;;  %1246 = vmatmul.msk.bf16.gmra.mxu1 %vm19_vm1, %v1278_v32 }
  0x77   :  { %1254 = vmatmul.msk.bf16.gmra.mxu2 %vm19_vm1, %v1286_v33  ;;  %1262 = vmatmul.msk.bf16.gmra.mxu3 %vm19_vm1, %v1294_v34 }
  0x83   :  { %v483_v36 = vpop.f32.mrf.mxu0  ;;  %v523_v37 = vpop.f32.mrf.mxu1 }
  0x84   :  { %v643_v38 = vadd.f32 %v483_v36, %v84_v35  ;;  %v659_v55 = vadd.f32 %v523_v37, %v100_v50 }
  0x86   :  { %707 = vst.msk [vmem:[#allocation2] sm:$0xff] %vm19_vm1, %v643_v38 }
  0x87   :  { %723 = vst.msk [vmem:[#allocation2 + $0x80] sm:$0xff] %vm19_vm1, %v659_v55 }
  0x8a   :  { %v563_v40 = vpop.f32.mrf.mxu2  ;;  %v603_v41 = vpop.f32.mrf.mxu3 }
  0x8b   :  { %v485_v42 = vpop.f32.mrf.mxu0  ;;  %v525_v43 = vpop.f32.mrf.mxu1  ;;  %v675_v57 = vadd.f32 %v563_v40, %v116_v53  ;;  %v691_v59 = vadd.f32 %v603_v41, %v132_v54 }
  0x8c   :  { %v644_v61 = vadd.f32 %v485_v42, %v85_v56  ;;  %v660_v63 = vadd.f32 %v525_v43, %v101_v58 }
  0x8d   :  { %v774_v44 = vld [vmem:[#allocation2] sm:$0xff]  ;;  %739 = vst.msk [vmem:[#allocation2 + $0x100] sm:$0xff] %vm19_vm1, %v675_v57 }
  0x8e   :  { %v842_v45 = vadd.f32 %v1555_v39, %v774_v44  ;;  %755 = vst.msk [vmem:[#allocation2 + $0x180] sm:$0xff] %vm19_vm1, %v691_v59  ;;  %v790_v17 = vld [vmem:[#allocation2 + $0x80] sm:$0xff] }
  0x8f   :  { %708 = vst.msk [vmem:[#allocation2 + $0x8] sm:$0xff] %vm19_vm1, %v644_v61  ;;  %v858_v19 = vadd.f32 %v1555_v39, %v790_v17 }
  0x90   :  { %v906_v46 = vmax.f32 %v842_v45, 0.0  ;;  %724 = vst.msk [vmem:[#allocation2 + $0x88] sm:$0xff] %vm19_vm1, %v660_v63 }
  0x91   :  { %v922_v29 = vmax.f32 %v858_v19, 0.0 }
  0x92   :  { %v970_v47 = vpack.c.bf16 %v906_v46, %v906_v46  ;;  %v565_v48 = vpop.f32.mrf.mxu2  ;;  %v605_v49 = vpop.f32.mrf.mxu3 }
  0x93   :  { %v488_v51 = vpop.f32.mrf.mxu0  ;;  %v528_v52 = vpop.f32.mrf.mxu1  ;;  %v676_v3 = vadd.f32 %v565_v48, %v117_v60  ;;  %v692_v7 = vadd.f32 %v605_v49, %v133_v62  ;;  %v986_v35 = vpack.c.bf16 %v922_v29, %v922_v29 }
  0x94   :  { %1035 = vst.msk [vmem:[%s2001_s3] sm:$0xf] %vm1034_vm2, %v970_v47  ;;  %v645_v9 = vadd.f32 %v488_v51, %v86_v0  ;;  %v661_v11 = vadd.f32 %v528_v52, %v102_v4  ;;  %v806_v20 = vld [vmem:[#allocation2 + $0x100] sm:$0xff] }
  0x95   :  { %740 = vst.msk [vmem:[#allocation2 + $0x108] sm:$0xff] %vm19_vm1, %v676_v3  ;;  %v874_v24 = vadd.f32 %v1555_v39, %v806_v20  ;;  %v822_v25 = vld [vmem:[#allocation2 + $0x180] sm:$0xff] }
  0x96   :  { %756 = vst.msk [vmem:[#allocation2 + $0x188] sm:$0xff] %vm19_vm1, %v692_v7  ;;  %v890_v30 = vadd.f32 %v1555_v39, %v822_v25  ;;  %v775_v31 = vld [vmem:[#allocation2 + $0x8] sm:$0xff]  ;;  %v120_v25 = vld [vmem:[#allocation2 + $0x120] sm:$0xff] }
  0x97   :  { %709 = vst.msk [vmem:[#allocation2 + $0x10] sm:$0xff] %vm19_vm1, %v645_v9  ;;  %v938_v32 = vmax.f32 %v874_v24, 0.0  ;;  %v843_v33 = vadd.f32 %v1555_v39, %v775_v31  ;;  %v791_v34 = vld [vmem:[#allocation2 + $0x88] sm:$0xff] }
  0x98   :  { %725 = vst.msk [vmem:[#allocation2 + $0x90] sm:$0xff] %vm19_vm1, %v661_v11  ;;  %v954_v36 = vmax.f32 %v890_v30, 0.0  ;;  %v859_v37 = vadd.f32 %v1555_v39, %v791_v34 }
  0x99   :  { %v1002_v40 = vpack.c.bf16 %v938_v32, %v938_v32  ;;  %v907_v41 = vmax.f32 %v843_v33, 0.0  ;;  %1051 = vst.msk [vmem:[%s2001_s3 + $0x40] sm:$0xf] %vm1034_vm2, %v986_v35  ;;  %v136_v32 = vld [vmem:[#allocation2 + $0x1a0] sm:$0xff]  ;;  %v89_v35 = vld [vmem:[#allocation2 + $0x28] sm:$0xff] }
  0x9a   :  { %v568_v1 = vpop.f32.mrf.mxu2  ;;  %v608_v2 = vpop.f32.mrf.mxu3  ;;  %v1018_v44 = vpack.c.bf16 %v954_v36, %v954_v36  ;;  %v923_v45 = vmax.f32 %v859_v37, 0.0  ;;  %v105_v37 = vld [vmem:[#allocation2 + $0xa8] sm:$0xff] }
  0x9b   :  { %v490_v5 = vpop.f32.mrf.mxu0  ;;  %v530_v6 = vpop.f32.mrf.mxu1  ;;  %v677_v13 = vadd.f32 %v568_v1, %v118_v8  ;;  %v693_v15 = vadd.f32 %v608_v2, %v134_v10  ;;  %1067 = vst.msk [vmem:[%s2001_s3 + $0x80] sm:$0xf] %vm1034_vm2, %v1002_v40  ;;  %v971_v48 = vpack.c.bf16 %v907_v41, %v907_v41  ;;  %v137_v41 = vld [vmem:[#allocation2 + $0x1a8] sm:$0xff] }
  0x9c   :  { %v646_v18 = vadd.f32 %v490_v5, %v87_v12  ;;  %v662_v21 = vadd.f32 %v530_v6, %v103_v14  ;;  %v807_v38 = vld [vmem:[#allocation2 + $0x108] sm:$0xff]  ;;  %1083 = vst.msk [vmem:[%s2001_s3 + $0xc0] sm:$0xf] %vm1034_vm2, %v1018_v44  ;;  %v987_v52 = vpack.c.bf16 %v923_v45, %v923_v45  ;;  %v106_v44 = vld [vmem:[#allocation2 + $0xb0] sm:$0xff] }
  0x9d   :  { %741 = vst.msk [vmem:[#allocation2 + $0x110] sm:$0xff] %vm19_vm1, %v677_v13  ;;  %v875_v42 = vadd.f32 %v1555_v39, %v807_v38  ;;  %v823_v43 = vld [vmem:[#allocation2 + $0x188] sm:$0xff] }
  0x9e   :  { %757 = vst.msk [vmem:[#allocation2 + $0x190] sm:$0xff] %vm19_vm1, %v693_v15  ;;  %v891_v46 = vadd.f32 %v1555_v39, %v823_v43  ;;  %v776_v47 = vld [vmem:[#allocation2 + $0x10] sm:$0xff]  ;;  %v135_v15 = vld [vmem:[#allocation2 + $0x198] sm:$0xff]  ;;  %v121_v38 = vld [vmem:[#allocation2 + $0x128] sm:$0xff] }
  0x9f   :  { %710 = vst.msk [vmem:[#allocation2 + $0x18] sm:$0xff] %vm19_vm1, %v646_v18  ;;  %v939_v49 = vmax.f32 %v875_v42, 0.0  ;;  %v844_v50 = vadd.f32 %v1555_v39, %v776_v47  ;;  %v792_v51 = vld [vmem:[#allocation2 + $0x90] sm:$0xff]  ;;  %v88_v18 = vld [vmem:[#allocation2 + $0x20] sm:$0xff] }
  0xa0   :  { %726 = vst.msk [vmem:[#allocation2 + $0x98] sm:$0xff] %vm19_vm1, %v662_v21  ;;  %v955_v53 = vmax.f32 %v891_v46, 0.0  ;;  %v860_v54 = vadd.f32 %v1555_v39, %v792_v51  ;;  %v104_v21 = vld [vmem:[#allocation2 + $0xa0] sm:$0xff]  ;;  %v122_v46 = vld [vmem:[#allocation2 + $0x130] sm:$0xff] }
  0xa1   :  { %1036 = vst.msk [vmem:[%s2001_s3 + $0x4] sm:$0xf] %vm1034_vm2, %v971_v48  ;;  %v1003_v58 = vpack.c.bf16 %v939_v49, %v939_v49  ;;  %v908_v59 = vmax.f32 %v844_v50, 0.0  ;;  %v138_v50 = vld [vmem:[#allocation2 + $0x1b0] sm:$0xff] }
  0xa2   :  { %v570_v22 = vpop.f32.mrf.mxu2  ;;  %v1602_v23 = vpop.f32.mrf.mxu3  ;;  %1052 = vst.msk [vmem:[%s2001_s3 + $0x44] sm:$0xf] %vm1034_vm2, %v987_v52  ;;  %v1019_v0 = vpack.c.bf16 %v955_v53, %v955_v53  ;;  %v924_v1 = vmax.f32 %v860_v54, 0.0  ;;  %v91_v54 = vld [vmem:[#allocation2 + $0x38] sm:$0xff] }
  0xa3   :  { %v678_v26 = vadd.f32 %v570_v22, %v119_v16  ;;  %v1606_v27 = vpop.f32.mrf.mxu0  ;;  %v1608_v28 = vpop.f32.mrf.mxu1  ;;  %1068 = vst.msk [vmem:[%s2001_s3 + $0x84] sm:$0xf] %vm1034_vm2, %v1003_v58  ;;  %v972_v4 = vpack.c.bf16 %v908_v59, %v908_v59  ;;  %v694_v24 = vadd.f32 %v1602_v23, %v135_v15 }
  0xa4   :  { %v808_v55 = vld [vmem:[#allocation2 + $0x110] sm:$0xff]  ;;  %1084 = vst.msk [vmem:[%s2001_s3 + $0xc4] sm:$0xf] %vm1034_vm2, %v1019_v0  ;;  %v988_v8 = vpack.c.bf16 %v924_v1, %v924_v1  ;;  %v647_v31 = vadd.f32 %v1606_v27, %v88_v18  ;;  %v663_v23 = vadd.f32 %v1608_v28, %v104_v21 }
  0xa5   :  { %742 = vst.msk [vmem:[#allocation2 + $0x118] sm:$0xff] %vm19_vm1, %v678_v26  ;;  %v876_v60 = vadd.f32 %v1555_v39, %v808_v55  ;;  %v824_v61 = vld [vmem:[#allocation2 + $0x190] sm:$0xff] }
  0xa6   :  { %v892_v2 = vadd.f32 %v1555_v39, %v824_v61  ;;  %v777_v3 = vld [vmem:[#allocation2 + $0x18] sm:$0xff]  ;;  %1037 = vst.msk [vmem:[%s2001_s3 + $0x8] sm:$0xf] %vm1034_vm2, %v972_v4  ;;  %v90_v28 = vld [vmem:[#allocation2 + $0x30] sm:$0xff] }
  0xa7   :  { %v940_v5 = vmax.f32 %v876_v60, 0.0  ;;  %v845_v6 = vadd.f32 %v1555_v39, %v777_v3  ;;  %v793_v7 = vld [vmem:[#allocation2 + $0x98] sm:$0xff]  ;;  %1053 = vst.msk [vmem:[%s2001_s3 + $0x48] sm:$0xf] %vm1034_vm2, %v988_v8 }
  0xa8   :  { %v956_v9 = vmax.f32 %v892_v2, 0.0  ;;  %v861_v10 = vadd.f32 %v1555_v39, %v793_v7  ;;  %758 = vst.msk [vmem:[#allocation2 + $0x198] sm:$0xff] %vm19_vm1, %v694_v24 }
  0xa9   :  { %v1004_v12 = vpack.c.bf16 %v940_v5, %v940_v5  ;;  %v909_v13 = vmax.f32 %v845_v6, 0.0  ;;  %711 = vst.msk [vmem:[#allocation2 + $0x20] sm:$0xff] %vm19_vm1, %v647_v31 }
  0xaa   :  { %v573_v56 = vpop.f32.mrf.mxu2  ;;  %v613_v57 = vpop.f32.mrf.mxu3  ;;  %v1020_v16 = vpack.c.bf16 %v956_v9, %v956_v9  ;;  %v925_v17 = vmax.f32 %v861_v10, 0.0  ;;  %727 = vst.msk [vmem:[#allocation2 + $0xa0] sm:$0xff] %vm19_vm1, %v663_v23 }
  0xab   :  { %v495_v62 = vpop.f32.mrf.mxu0  ;;  %v535_v63 = vpop.f32.mrf.mxu1  ;;  %1069 = vst.msk [vmem:[%s2001_s3 + $0x88] sm:$0xf] %vm1034_vm2, %v1004_v12  ;;  %v973_v19 = vpack.c.bf16 %v909_v13, %v909_v13  ;;  %v679_v36 = vadd.f32 %v573_v56, %v120_v25  ;;  %v695_v27 = vadd.f32 %v613_v57, %v136_v32 }
  0xac   :  { %v809_v11 = vld [vmem:[#allocation2 + $0x118] sm:$0xff]  ;;  %1085 = vst.msk [vmem:[%s2001_s3 + $0xc8] sm:$0xf] %vm1034_vm2, %v1020_v16  ;;  %v989_v22 = vpack.c.bf16 %v925_v17, %v925_v17  ;;  %v648_v40 = vadd.f32 %v495_v62, %v89_v35  ;;  %v664_v42 = vadd.f32 %v535_v63, %v105_v37 }
  0xad   :  { %v877_v14 = vadd.f32 %v1555_v39, %v809_v11  ;;  %1038 = vst.msk [vmem:[%s2001_s3 + $0xc] sm:$0xf] %vm1034_vm2, %v973_v19 }
  0xae   :  { %1054 = vst.msk [vmem:[%s2001_s3 + $0x4c] sm:$0xf] %vm1034_vm2, %v989_v22 }
  0xaf   :  { %v941_v20 = vmax.f32 %v877_v14, 0.0  ;;  %743 = vst.msk [vmem:[#allocation2 + $0x120] sm:$0xff] %vm19_vm1, %v679_v36  ;;  %v825_v55 = vld [vmem:[#allocation2 + $0x198] sm:$0xff] }
  0xb0   :  { %759 = vst.msk [vmem:[#allocation2 + $0x1a0] sm:$0xff] %vm19_vm1, %v695_v27  ;;  %v893_v57 = vadd.f32 %v1555_v39, %v825_v55  ;;  %v778_v58 = vld [vmem:[#allocation2 + $0x20] sm:$0xff] }
  0xb1   :  { %v1005_v30 = vpack.c.bf16 %v941_v20, %v941_v20  ;;  %712 = vst.msk [vmem:[#allocation2 + $0x28] sm:$0xff] %vm19_vm1, %v648_v40  ;;  %v846_v60 = vadd.f32 %v1555_v39, %v778_v58  ;;  %v794_v61 = vld [vmem:[#allocation2 + $0xa0] sm:$0xff] }
  0xb2   :  { %v575_v26 = vpop.f32.mrf.mxu2  ;;  %v615_v29 = vpop.f32.mrf.mxu3  ;;  %728 = vst.msk [vmem:[#allocation2 + $0xa8] sm:$0xff] %vm19_vm1, %v664_v42  ;;  %v957_v63 = vmax.f32 %v893_v57, 0.0  ;;  %v862_v0 = vadd.f32 %v1555_v39, %v794_v61  ;;  %v123_v57 = vld [vmem:[#allocation2 + $0x138] sm:$0xff] }
  0xb3   :  { %v498_v33 = vpop.f32.mrf.mxu0  ;;  %v538_v34 = vpop.f32.mrf.mxu1  ;;  %1070 = vst.msk [vmem:[%s2001_s3 + $0x8c] sm:$0xf] %vm1034_vm2, %v1005_v30  ;;  %v680_v43 = vadd.f32 %v575_v26, %v121_v38  ;;  %v696_v45 = vadd.f32 %v615_v29, %v137_v41  ;;  %v910_v2 = vmax.f32 %v846_v60, 0.0  ;;  %v139_v60 = vld [vmem:[#allocation2 + $0x1b8] sm:$0xff] }
  0xb4   :  { %v649_v49 = vadd.f32 %v498_v33, %v90_v28  ;;  %v665_v53 = vadd.f32 %v538_v34, %v106_v44  ;;  %v1021_v5 = vpack.c.bf16 %v957_v63, %v957_v63  ;;  %v926_v6 = vmax.f32 %v862_v0, 0.0  ;;  %v92_v63 = vld [vmem:[#allocation2 + $0x40] sm:$0xff] }
  0xb5   :  { %744 = vst.msk [vmem:[#allocation2 + $0x128] sm:$0xff] %vm19_vm1, %v680_v43  ;;  %v974_v11 = vpack.c.bf16 %v910_v2, %v910_v2  ;;  %v108_v2 = vld [vmem:[#allocation2 + $0xc0] sm:$0xff] }
  0xb6   :  { %760 = vst.msk [vmem:[#allocation2 + $0x1a8] sm:$0xff] %vm19_vm1, %v696_v45  ;;  %v810_v1 = vld [vmem:[#allocation2 + $0x120] sm:$0xff]  ;;  %v990_v17 = vpack.c.bf16 %v926_v6, %v926_v6 }
  0xb7   :  { %713 = vst.msk [vmem:[#allocation2 + $0x30] sm:$0xff] %vm19_vm1, %v649_v49  ;;  %v878_v3 = vadd.f32 %v1555_v39, %v810_v1  ;;  %v826_v4 = vld [vmem:[#allocation2 + $0x1a0] sm:$0xff] }
  0xb8   :  { %729 = vst.msk [vmem:[#allocation2 + $0xb0] sm:$0xff] %vm19_vm1, %v665_v53  ;;  %v894_v7 = vadd.f32 %v1555_v39, %v826_v4  ;;  %v779_v8 = vld [vmem:[#allocation2 + $0x28] sm:$0xff]  ;;  %v124_v4 = vld [vmem:[#allocation2 + $0x140] sm:$0xff] }
  0xb9   :  { %v942_v12 = vmax.f32 %v878_v3, 0.0  ;;  %v847_v13 = vadd.f32 %v1555_v39, %v779_v8  ;;  %v795_v14 = vld [vmem:[#allocation2 + $0xa8] sm:$0xff]  ;;  %1086 = vst.msk [vmem:[%s2001_s3 + $0xcc] sm:$0xf] %vm1034_vm2, %v1021_v5  ;;  %v140_v5 = vld [vmem:[#allocation2 + $0x1c0] sm:$0xff] }
  0xba   :  { %v578_v47 = vpop.f32.mrf.mxu2  ;;  %v618_v48 = vpop.f32.mrf.mxu3  ;;  %v958_v18 = vmax.f32 %v894_v7, 0.0  ;;  %v863_v19 = vadd.f32 %v1555_v39, %v795_v14  ;;  %1039 = vst.msk [vmem:[%s2001_s3 + $0x10] sm:$0xf] %vm1034_vm2, %v974_v11  ;;  %v93_v7 = vld [vmem:[#allocation2 + $0x48] sm:$0xff] }
  0xbb   :  { %v500_v51 = vpop.f32.mrf.mxu0  ;;  %v1691_v52 = vpop.f32.mrf.mxu1  ;;  %v681_v56 = vadd.f32 %v578_v47, %v122_v46  ;;  %v697_v59 = vadd.f32 %v618_v48, %v138_v50  ;;  %v1006_v21 = vpack.c.bf16 %v942_v12, %v942_v12  ;;  %v911_v22 = vmax.f32 %v847_v13, 0.0  ;;  %1055 = vst.msk [vmem:[%s2001_s3 + $0x50] sm:$0xf] %vm1034_vm2, %v990_v17  ;;  %v125_v17 = vld [vmem:[#allocation2 + $0x148] sm:$0xff] }
  0xbc   :  { %v650_v62 = vadd.f32 %v500_v51, %v91_v54  ;;  %v811_v20 = vld [vmem:[#allocation2 + $0x128] sm:$0xff]  ;;  %v1022_v26 = vpack.c.bf16 %v958_v18, %v958_v18  ;;  %v927_v29 = vmax.f32 %v863_v19, 0.0  ;;  %v107_v51 = vld [vmem:[#allocation2 + $0xb8] sm:$0xff]  ;;  %v94_v19 = vld [vmem:[#allocation2 + $0x50] sm:$0xff] }
  0xbd   :  { %745 = vst.msk [vmem:[#allocation2 + $0x130] sm:$0xff] %vm19_vm1, %v681_v56  ;;  %v879_v24 = vadd.f32 %v1555_v39, %v811_v20  ;;  %v827_v25 = vld [vmem:[#allocation2 + $0x1a8] sm:$0xff]  ;;  %v975_v32 = vpack.c.bf16 %v911_v22, %v911_v22 }
  0xbe   :  { %761 = vst.msk [vmem:[#allocation2 + $0x1b0] sm:$0xff] %vm19_vm1, %v697_v59  ;;  %v895_v30 = vadd.f32 %v1555_v39, %v827_v25  ;;  %v780_v31 = vld [vmem:[#allocation2 + $0x30] sm:$0xff]  ;;  %v991_v35 = vpack.c.bf16 %v927_v29, %v927_v29  ;;  %v141_v18 = vld [vmem:[#allocation2 + $0x1c8] sm:$0xff] }
  0xbf   :  { %714 = vst.msk [vmem:[#allocation2 + $0x38] sm:$0xff] %vm19_vm1, %v650_v62  ;;  %v943_v33 = vmax.f32 %v879_v24, 0.0  ;;  %v848_v34 = vadd.f32 %v1555_v39, %v780_v31  ;;  %v796_v23 = vld [vmem:[#allocation2 + $0xb0] sm:$0xff]  ;;  %v666_v62 = vadd.f32 %v1691_v52, %v107_v51 }
  0xc0   :  { %1071 = vst.msk [vmem:[%s2001_s3 + $0x90] sm:$0xf] %vm1034_vm2, %v1006_v21  ;;  %v959_v36 = vmax.f32 %v895_v30, 0.0  ;;  %v864_v37 = vadd.f32 %v1555_v39, %v796_v23  ;;  %v110_v21 = vld [vmem:[#allocation2 + $0xd0] sm:$0xff] }
  0xc1   :  { %1087 = vst.msk [vmem:[%s2001_s3 + $0xd0] sm:$0xf] %vm1034_vm2, %v1022_v26  ;;  %v1007_v38 = vpack.c.bf16 %v943_v33, %v943_v33  ;;  %v912_v40 = vmax.f32 %v848_v34, 0.0  ;;  %v126_v24 = vld [vmem:[#allocation2 + $0x150] sm:$0xff] }
  0xc2   :  { %v1705_v9 = vpop.f32.mrf.mxu2  ;;  %v1707_v10 = vpop.f32.mrf.mxu3  ;;  %1040 = vst.msk [vmem:[%s2001_s3 + $0x14] sm:$0xf] %vm1034_vm2, %v975_v32  ;;  %v1023_v28 = vpack.c.bf16 %v959_v36, %v959_v36  ;;  %v928_v43 = vmax.f32 %v864_v37, 0.0 }
  0xc3   :  { %v1711_v15 = vpop.f32.mrf.mxu0  ;;  %v1713_v16 = vpop.f32.mrf.mxu1  ;;  %1056 = vst.msk [vmem:[%s2001_s3 + $0x54] sm:$0xf] %vm1034_vm2, %v991_v35  ;;  %v976_v48 = vpack.c.bf16 %v912_v40, %v912_v40  ;;  %v682_v1 = vadd.f32 %v1705_v9, %v123_v57  ;;  %v698_v3 = vadd.f32 %v1707_v10, %v139_v60  ;;  %v109_v10 = vld [vmem:[#allocation2 + $0xc8] sm:$0xff] }
  0xc4   :  { %v812_v27 = vld [vmem:[#allocation2 + $0x130] sm:$0xff]  ;;  %1072 = vst.msk [vmem:[%s2001_s3 + $0x94] sm:$0xf] %vm1034_vm2, %v1007_v38  ;;  %v992_v55 = vpack.c.bf16 %v928_v43, %v928_v43  ;;  %v651_v52 = vadd.f32 %v1711_v15, %v92_v63  ;;  %v667_v6 = vadd.f32 %v1713_v16, %v108_v2 }
  0xc5   :  { %v880_v41 = vadd.f32 %v1555_v39, %v812_v27  ;;  %v828_v42 = vld [vmem:[#allocation2 + $0x1b0] sm:$0xff]  ;;  %1088 = vst.msk [vmem:[%s2001_s3 + $0xd4] sm:$0xf] %vm1034_vm2, %v1023_v28 }
  0xc6   :  { %v896_v44 = vadd.f32 %v1555_v39, %v828_v42  ;;  %v781_v45 = vld [vmem:[#allocation2 + $0x38] sm:$0xff]  ;;  %1041 = vst.msk [vmem:[%s2001_s3 + $0x18] sm:$0xf] %vm1034_vm2, %v976_v48 }
  0xc7   :  { %v944_v49 = vmax.f32 %v880_v41, 0.0  ;;  %v849_v50 = vadd.f32 %v1555_v39, %v781_v45  ;;  %1057 = vst.msk [vmem:[%s2001_s3 + $0x58] sm:$0xf] %vm1034_vm2, %v992_v55 }
  0xc8   :  { %v960_v56 = vmax.f32 %v896_v44, 0.0  ;;  %730 = vst.msk [vmem:[#allocation2 + $0xb8] sm:$0xff] %vm19_vm1, %v666_v62 }
  0xc9   :  { %v1008_v58 = vpack.c.bf16 %v944_v49, %v944_v49  ;;  %v913_v59 = vmax.f32 %v849_v50, 0.0  ;;  %746 = vst.msk [vmem:[#allocation2 + $0x138] sm:$0xff] %vm19_vm1, %v682_v1 }
  0xca   :  { %v583_v46 = vpop.f32.mrf.mxu2  ;;  %v623_v47 = vpop.f32.mrf.mxu3  ;;  %v1024_v61 = vpack.c.bf16 %v960_v56, %v960_v56  ;;  %762 = vst.msk [vmem:[#allocation2 + $0x1b8] sm:$0xff] %vm19_vm1, %v698_v3 }
  0xcb   :  { %v505_v53 = vpop.f32.mrf.mxu0  ;;  %v545_v54 = vpop.f32.mrf.mxu1  ;;  %1073 = vst.msk [vmem:[%s2001_s3 + $0x98] sm:$0xf] %vm1034_vm2, %v1008_v58  ;;  %v977_v0 = vpack.c.bf16 %v913_v59, %v913_v59  ;;  %v683_v11 = vadd.f32 %v583_v46, %v124_v4  ;;  %v699_v14 = vadd.f32 %v623_v47, %v140_v5 }
  0xcc   :  { %1089 = vst.msk [vmem:[%s2001_s3 + $0xd8] sm:$0xf] %vm1034_vm2, %v1024_v61  ;;  %v652_v15 = vadd.f32 %v505_v53, %v93_v7  ;;  %v668_v16 = vadd.f32 %v545_v54, %v109_v10 }
  0xcd   :  { %1042 = vst.msk [vmem:[%s2001_s3 + $0x1c] sm:$0xf] %vm1034_vm2, %v977_v0 }
  0xce   :  { %715 = vst.msk [vmem:[#allocation2 + $0x40] sm:$0xff] %vm19_vm1, %v651_v52 }
  0xcf   :  { %731 = vst.msk [vmem:[#allocation2 + $0xc0] sm:$0xff] %vm19_vm1, %v667_v6  ;;  %v797_v25 = vld [vmem:[#allocation2 + $0xb8] sm:$0xff] }
  0xd0   :  { %747 = vst.msk [vmem:[#allocation2 + $0x140] sm:$0xff] %vm19_vm1, %v683_v11  ;;  %v865_v29 = vadd.f32 %v1555_v39, %v797_v25  ;;  %v813_v30 = vld [vmem:[#allocation2 + $0x138] sm:$0xff] }
  0xd1   :  { %763 = vst.msk [vmem:[#allocation2 + $0x1c0] sm:$0xff] %vm19_vm1, %v699_v14  ;;  %v881_v34 = vadd.f32 %v1555_v39, %v813_v30  ;;  %v829_v23 = vld [vmem:[#allocation2 + $0x1b8] sm:$0xff] }
  0xd2   :  { %v585_v8 = vpop.f32.mrf.mxu2  ;;  %v625_v9 = vpop.f32.mrf.mxu3  ;;  %716 = vst.msk [vmem:[#allocation2 + $0x48] sm:$0xff] %vm19_vm1, %v652_v15  ;;  %v929_v37 = vmax.f32 %v865_v29, 0.0  ;;  %v897_v27 = vadd.f32 %v1555_v39, %v829_v23  ;;  %v127_v23 = vld [vmem:[#allocation2 + $0x158] sm:$0xff] }
  0xd3   :  { %v508_v12 = vpop.f32.mrf.mxu0  ;;  %v548_v13 = vpop.f32.mrf.mxu1  ;;  %v684_v20 = vadd.f32 %v585_v8, %v125_v17  ;;  %v700_v22 = vadd.f32 %v625_v9, %v141_v18  ;;  %732 = vst.msk [vmem:[#allocation2 + $0xc8] sm:$0xff] %vm19_vm1, %v668_v16  ;;  %v945_v40 = vmax.f32 %v881_v34, 0.0 }
  0xd4   :  { %v653_v26 = vadd.f32 %v508_v12, %v94_v19  ;;  %v669_v31 = vadd.f32 %v548_v13, %v110_v21  ;;  %v993_v43 = vpack.c.bf16 %v929_v37, %v929_v37  ;;  %v961_v44 = vmax.f32 %v897_v27, 0.0  ;;  %v142_v21 = vld [vmem:[#allocation2 + $0x1d0] sm:$0xff] }
  0xd5   :  { %748 = vst.msk [vmem:[#allocation2 + $0x148] sm:$0xff] %vm19_vm1, %v684_v20  ;;  %v782_v38 = vld [vmem:[#allocation2 + $0x40] sm:$0xff]  ;;  %v1009_v47 = vpack.c.bf16 %v945_v40, %v945_v40  ;;  %v143_v40 = vld [vmem:[#allocation2 + $0x1d8] sm:$0xff] }
  0xd6   :  { %764 = vst.msk [vmem:[#allocation2 + $0x1c8] sm:$0xff] %vm19_vm1, %v700_v22  ;;  %v850_v41 = vadd.f32 %v1555_v39, %v782_v38  ;;  %v798_v42 = vld [vmem:[#allocation2 + $0xc0] sm:$0xff]  ;;  %v1025_v51 = vpack.c.bf16 %v961_v44, %v961_v44 }
  0xd7   :  { %717 = vst.msk [vmem:[#allocation2 + $0x50] sm:$0xff] %vm19_vm1, %v653_v26  ;;  %v866_v45 = vadd.f32 %v1555_v39, %v798_v42  ;;  %v814_v46 = vld [vmem:[#allocation2 + $0x140] sm:$0xff]  ;;  %v95_v26 = vld [vmem:[#allocation2 + $0x58] sm:$0xff] }
  0xd8   :  { %733 = vst.msk [vmem:[#allocation2 + $0xd0] sm:$0xff] %vm19_vm1, %v669_v31  ;;  %v914_v48 = vmax.f32 %v850_v41, 0.0  ;;  %v882_v49 = vadd.f32 %v1555_v39, %v814_v46  ;;  %v830_v50 = vld [vmem:[#allocation2 + $0x1c0] sm:$0xff]  ;;  %v111_v31 = vld [vmem:[#allocation2 + $0xd8] sm:$0xff] }
  0xd9   :  { %1058 = vst.msk [vmem:[%s2001_s3 + $0x5c] sm:$0xf] %vm1034_vm2, %v993_v43  ;;  %v930_v53 = vmax.f32 %v866_v45, 0.0  ;;  %v898_v54 = vadd.f32 %v1555_v39, %v830_v50  ;;  %v783_v55 = vld [vmem:[#allocation2 + $0x48] sm:$0xff]  ;;  %v112_v44 = vld [vmem:[#allocation2 + $0xe0] sm:$0xff] }
  0xda   :  { %v588_v32 = vpop.f32.mrf.mxu2  ;;  %v1794_v33 = vpop.f32.mrf.mxu3  ;;  %1074 = vst.msk [vmem:[%s2001_s3 + $0x9c] sm:$0xf] %vm1034_vm2, %v1009_v47  ;;  %v978_v56 = vpack.c.bf16 %v914_v48, %v914_v48  ;;  %v946_v57 = vmax.f32 %v882_v49, 0.0  ;;  %v851_v58 = vadd.f32 %v1555_v39, %v783_v55  ;;  %v799_v59 = vld [vmem:[#allocation2 + $0xc8] sm:$0xff]  ;;  %v128_v45 = vld [vmem:[#allocation2 + $0x160] sm:$0xff] }
  0xdb   :  { %v685_v35 = vadd.f32 %v588_v32, %v126_v24  ;;  %v1798_v36 = vpop.f32.mrf.mxu0  ;;  %v1804_v28 = vpop.f32.mrf.mxu1  ;;  %1090 = vst.msk [vmem:[%s2001_s3 + $0xdc] sm:$0xf] %vm1034_vm2, %v1025_v51  ;;  %v994_v60 = vpack.c.bf16 %v930_v53, %v930_v53  ;;  %v962_v61 = vmax.f32 %v898_v54, 0.0  ;;  %v867_v62 = vadd.f32 %v1555_v39, %v799_v59  ;;  %v144_v47 = vld [vmem:[#allocation2 + $0x1e0] sm:$0xff]  ;;  %v97_v48 = vld [vmem:[#allocation2 + $0x68] sm:$0xff] }
  0xdc   :  { %v815_v63 = vld [vmem:[#allocation2 + $0x148] sm:$0xff]  ;;  %1043 = vst.msk [vmem:[%s2001_s3 + $0x20] sm:$0xf] %vm1034_vm2, %v978_v56  ;;  %v1010_v2 = vpack.c.bf16 %v946_v57, %v946_v57  ;;  %v915_v3 = vmax.f32 %v851_v58, 0.0  ;;  %v701_v34 = vadd.f32 %v1794_v33, %v142_v21  ;;  %v654_v38 = vadd.f32 %v1798_v36, %v95_v26  ;;  %v96_v33 = vld [vmem:[#allocation2 + $0x60] sm:$0xff] }
  0xdd   :  { %749 = vst.msk [vmem:[#allocation2 + $0x150] sm:$0xff] %vm19_vm1, %v685_v35  ;;  %v883_v4 = vadd.f32 %v1555_v39, %v815_v63  ;;  %v831_v52 = vld [vmem:[#allocation2 + $0x1c8] sm:$0xff]  ;;  %v1026_v6 = vpack.c.bf16 %v962_v61, %v962_v61  ;;  %v931_v7 = vmax.f32 %v867_v62, 0.0  ;;  %v670_v41 = vadd.f32 %v1804_v28, %v111_v31 }
  0xde   :  { %1059 = vst.msk [vmem:[%s2001_s3 + $0x60] sm:$0xf] %vm1034_vm2, %v994_v60  ;;  %v899_v8 = vadd.f32 %v1555_v39, %v831_v52  ;;  %v784_v9 = vld [vmem:[#allocation2 + $0x50] sm:$0xff]  ;;  %v979_v11 = vpack.c.bf16 %v915_v3, %v915_v3  ;;  %v113_v50 = vld [vmem:[#allocation2 + $0xe8] sm:$0xff] }
  0xdf   :  { %1075 = vst.msk [vmem:[%s2001_s3 + $0xa0] sm:$0xf] %vm1034_vm2, %v1010_v2  ;;  %v947_v10 = vmax.f32 %v883_v4, 0.0  ;;  %v852_v12 = vadd.f32 %v1555_v39, %v784_v9  ;;  %v800_v13 = vld [vmem:[#allocation2 + $0xd0] sm:$0xff]  ;;  %v995_v14 = vpack.c.bf16 %v931_v7, %v931_v7  ;;  %v129_v54 = vld [vmem:[#allocation2 + $0x168] sm:$0xff] }
  0xe0   :  { %1091 = vst.msk [vmem:[%s2001_s3 + $0xe0] sm:$0xf] %vm1034_vm2, %v1026_v6  ;;  %v963_v17 = vmax.f32 %v899_v8, 0.0  ;;  %v868_v15 = vadd.f32 %v1555_v39, %v800_v13  ;;  %v145_v57 = vld [vmem:[#allocation2 + $0x1e8] sm:$0xff]  ;;  %v98_v60 = vld [vmem:[#allocation2 + $0x70] sm:$0xff] }
  0xe1   :  { %1044 = vst.msk [vmem:[%s2001_s3 + $0x24] sm:$0xf] %vm1034_vm2, %v979_v11  ;;  %v1011_v16 = vpack.c.bf16 %v947_v10, %v947_v10  ;;  %v916_v19 = vmax.f32 %v852_v12, 0.0 }
  0xe2   :  { %v590_v0 = vpop.f32.mrf.mxu2  ;;  %v630_v1 = vpop.f32.mrf.mxu3  ;;  %1060 = vst.msk [vmem:[%s2001_s3 + $0x64] sm:$0xf] %vm1034_vm2, %v995_v14  ;;  %v1027_v24 = vpack.c.bf16 %v963_v17, %v963_v17  ;;  %v932_v25 = vmax.f32 %v868_v15, 0.0 }
  0xe3   :  { %v513_v5 = vpop.f32.mrf.mxu0  ;;  %v553_v22 = vpop.f32.mrf.mxu1  ;;  %1076 = vst.msk [vmem:[%s2001_s3 + $0xa4] sm:$0xf] %vm1034_vm2, %v1011_v16  ;;  %v980_v29 = vpack.c.bf16 %v916_v19, %v916_v19  ;;  %v686_v43 = vadd.f32 %v590_v0, %v127_v23  ;;  %v702_v36 = vadd.f32 %v630_v1, %v143_v40 }
  0xe4   :  { %v816_v18 = vld [vmem:[#allocation2 + $0x150] sm:$0xff]  ;;  %1092 = vst.msk [vmem:[%s2001_s3 + $0xe4] sm:$0xf] %vm1034_vm2, %v1027_v24  ;;  %v996_v32 = vpack.c.bf16 %v932_v25, %v932_v25  ;;  %v655_v46 = vadd.f32 %v513_v5, %v96_v33  ;;  %v671_v28 = vadd.f32 %v553_v22, %v112_v44 }
  0xe5   :  { %v884_v20 = vadd.f32 %v1555_v39, %v816_v18  ;;  %1045 = vst.msk [vmem:[%s2001_s3 + $0x28] sm:$0xf] %vm1034_vm2, %v980_v29 }
  0xe6   :  { %1061 = vst.msk [vmem:[%s2001_s3 + $0x68] sm:$0xf] %vm1034_vm2, %v996_v32 }
  0xe7   :  { %v948_v30 = vmax.f32 %v884_v20, 0.0  ;;  %765 = vst.msk [vmem:[#allocation2 + $0x1d0] sm:$0xff] %vm19_vm1, %v701_v34 }
  0xe8   :  { %718 = vst.msk [vmem:[#allocation2 + $0x58] sm:$0xff] %vm19_vm1, %v654_v38 }
  0xe9   :  { %v1012_v27 = vpack.c.bf16 %v948_v30, %v948_v30  ;;  %734 = vst.msk [vmem:[#allocation2 + $0xd8] sm:$0xff] %vm19_vm1, %v670_v41 }
  0xea   :  { %v593_v35 = vpop.f32.mrf.mxu2  ;;  %v633_v37 = vpop.f32.mrf.mxu3  ;;  %750 = vst.msk [vmem:[#allocation2 + $0x158] sm:$0xff] %vm19_vm1, %v686_v43 }
  0xeb   :  { %v515_v42 = vpop.f32.mrf.mxu0  ;;  %1077 = vst.msk [vmem:[%s2001_s3 + $0xa8] sm:$0xf] %vm1034_vm2, %v1012_v27  ;;  %v687_v49 = vadd.f32 %v593_v35, %v128_v45  ;;  %v555_v51 = vpop.f32.mrf.mxu1  ;;  %v703_v53 = vadd.f32 %v633_v37, %v144_v47 }
  0xec   :  { %766 = vst.msk [vmem:[#allocation2 + $0x1d8] sm:$0xff] %vm19_vm1, %v702_v36  ;;  %v656_v56 = vadd.f32 %v515_v42, %v97_v48  ;;  %v672_v59 = vadd.f32 %v555_v51, %v113_v50 }
  0xed   :  { %719 = vst.msk [vmem:[#allocation2 + $0x60] sm:$0xff] %vm19_vm1, %v655_v46 }
  0xee   :  { %735 = vst.msk [vmem:[#allocation2 + $0xe0] sm:$0xff] %vm19_vm1, %v671_v28  ;;  %v832_v61 = vld [vmem:[#allocation2 + $0x1d0] sm:$0xff] }
  0xef   :  { %751 = vst.msk [vmem:[#allocation2 + $0x160] sm:$0xff] %vm19_vm1, %v687_v49  ;;  %v900_v63 = vadd.f32 %v1555_v39, %v832_v61  ;;  %v785_v0 = vld [vmem:[#allocation2 + $0x58] sm:$0xff]  ;;  %v146_v61 = vld [vmem:[#allocation2 + $0x1f0] sm:$0xff] }
  0xf0   :  { %767 = vst.msk [vmem:[#allocation2 + $0x1e0] sm:$0xff] %vm19_vm1, %v703_v53  ;;  %v853_v3 = vadd.f32 %v1555_v39, %v785_v0  ;;  %v801_v4 = vld [vmem:[#allocation2 + $0xd8] sm:$0xff] }
  0xf1   :  { %720 = vst.msk [vmem:[#allocation2 + $0x68] sm:$0xff] %vm19_vm1, %v656_v56  ;;  %v964_v5 = vmax.f32 %v900_v63, 0.0  ;;  %v869_v6 = vadd.f32 %v1555_v39, %v801_v4  ;;  %v817_v7 = vld [vmem:[#allocation2 + $0x158] sm:$0xff]  ;;  %v114_v56 = vld [vmem:[#allocation2 + $0xf0] sm:$0xff] }
  0xf2   :  { %v595_v55 = vpop.f32.mrf.mxu2  ;;  %v635_v58 = vpop.f32.mrf.mxu3  ;;  %736 = vst.msk [vmem:[#allocation2 + $0xe8] sm:$0xff] %vm19_vm1, %v672_v59  ;;  %v917_v8 = vmax.f32 %v853_v3, 0.0  ;;  %v885_v9 = vadd.f32 %v1555_v39, %v817_v7  ;;  %v99_v0 = vld [vmem:[#allocation2 + $0x78] sm:$0xff] }
  0xf3   :  { %v688_v62 = vadd.f32 %v595_v55, %v129_v54  ;;  %v704_v1 = vadd.f32 %v635_v58, %v145_v57  ;;  %v518_v2 = vpop.f32.mrf.mxu0  ;;  %v833_v11 = vld [vmem:[#allocation2 + $0x1d8] sm:$0xff]  ;;  %v1028_v10 = vpack.c.bf16 %v964_v5, %v964_v5  ;;  %v933_v12 = vmax.f32 %v869_v6, 0.0  ;;  %v558_v30 = vpop.f32.mrf.mxu1  ;;  %v1300_v54 = vld [vmem:[%s2000_s2] ss:$0 sm:$0xff]  ;;  %v130_v58 = vld [vmem:[#allocation2 + $0x170] sm:$0xff] }
  0xf4   :  { %v657_v52 = vadd.f32 %v518_v2, %v98_v60  ;;  %v901_v13 = vadd.f32 %v1555_v39, %v833_v11  ;;  %v786_v14 = vld [vmem:[#allocation2 + $0x60] sm:$0xff]  ;;  %v981_v17 = vpack.c.bf16 %v917_v8, %v917_v8  ;;  %v949_v15 = vmax.f32 %v885_v9, 0.0  ;;  %v115_v4 = vld [vmem:[#allocation2 + $0xf8] sm:$0xff] }
  0xf5   :  { %752 = vst.msk [vmem:[#allocation2 + $0x168] sm:$0xff] %vm19_vm1, %v688_v62  ;;  %v854_v18 = vadd.f32 %v1555_v39, %v786_v14  ;;  %v802_v16 = vld [vmem:[#allocation2 + $0xe0] sm:$0xff]  ;;  %v997_v19 = vpack.c.bf16 %v933_v12, %v933_v12  ;;  %v673_v63 = vadd.f32 %v558_v30, %v114_v56  ;;  %v131_v6 = vld [vmem:[#allocation2 + $0x178] sm:$0xff] }
  0xf6   :  { %768 = vst.msk [vmem:[#allocation2 + $0x1e8] sm:$0xff] %vm19_vm1, %v704_v1  ;;  %v965_v20 = vmax.f32 %v901_v13, 0.0  ;;  %v870_v21 = vadd.f32 %v1555_v39, %v802_v16  ;;  %v818_v22 = vld [vmem:[#allocation2 + $0x160] sm:$0xff]  ;;  %v1013_v24 = vpack.c.bf16 %v949_v15, %v949_v15  ;;  %v147_v9 = vld [vmem:[#allocation2 + $0x1f8] sm:$0xff] }
  0xf7   :  { %721 = vst.msk [vmem:[#allocation2 + $0x70] sm:$0xff] %vm19_vm1, %v657_v52  ;;  %v918_v25 = vmax.f32 %v854_v18, 0.0  ;;  %v886_v26 = vadd.f32 %v1555_v39, %v818_v22  ;;  %v834_v29 = vld [vmem:[#allocation2 + $0x1e0] sm:$0xff] }
  0xf8   :  { %1093 = vst.msk [vmem:[%s2001_s3 + $0xe8] sm:$0xf] %vm1034_vm2, %v1028_v10  ;;  %v1029_v31 = vpack.c.bf16 %v965_v20, %v965_v20  ;;  %v934_v32 = vmax.f32 %v870_v21, 0.0  ;;  %v902_v34 = vadd.f32 %v1555_v39, %v834_v29  ;;  %v787_v23 = vld [vmem:[#allocation2 + $0x68] sm:$0xff] }
  0xf9   :  { %1046 = vst.msk [vmem:[%s2001_s3 + $0x2c] sm:$0xf] %vm1034_vm2, %v981_v17  ;;  %v982_v37 = vpack.c.bf16 %v918_v25, %v918_v25  ;;  %v950_v27 = vmax.f32 %v886_v26, 0.0  ;;  %v855_v38 = vadd.f32 %v1555_v39, %v787_v23  ;;  %v803_v40 = vld [vmem:[#allocation2 + $0xe8] sm:$0xff] }
  0xfa   :  { %1062 = vst.msk [vmem:[%s2001_s3 + $0x6c] sm:$0xf] %vm1034_vm2, %v997_v19  ;;  %v598_v35 = vpop.f32.mrf.mxu2  ;;  %v638_v41 = vpop.f32.mrf.mxu3  ;;  %v998_v33 = vpack.c.bf16 %v934_v32, %v934_v32  ;;  %v966_v42 = vmax.f32 %v902_v34, 0.0  ;;  %v871_v43 = vadd.f32 %v1555_v39, %v803_v40 }
  0xfb   :  { %1078 = vst.msk [vmem:[%s2001_s3 + $0xac] sm:$0xf] %vm1034_vm2, %v1013_v24  ;;  %v1014_v36 = vpack.c.bf16 %v950_v27, %v950_v27  ;;  %v919_v45 = vmax.f32 %v855_v38, 0.0  ;;  %v520_v1 = vpop.f32.mrf.mxu0  ;;  %v689_v3 = vadd.f32 %v598_v35, %v130_v58  ;;  %v560_v52 = vpop.f32.mrf.mxu1  ;;  %v705_v5 = vadd.f32 %v638_v41, %v146_v61 }
  0xfc   :  { %1094 = vst.msk [vmem:[%s2001_s3 + $0xec] sm:$0xf] %vm1034_vm2, %v1029_v31  ;;  %v819_v44 = vld [vmem:[#allocation2 + $0x168] sm:$0xff]  ;;  %v1030_v28 = vpack.c.bf16 %v966_v42, %v966_v42  ;;  %v935_v48 = vmax.f32 %v871_v43, 0.0  ;;  %v658_v8 = vadd.f32 %v520_v1, %v99_v0  ;;  %v674_v10 = vadd.f32 %v560_v52, %v115_v4 }
  0xfd   :  { %1047 = vst.msk [vmem:[%s2001_s3 + $0x30] sm:$0xf] %vm1034_vm2, %v982_v37  ;;  %v887_v46 = vadd.f32 %v1555_v39, %v819_v44  ;;  %v835_v47 = vld [vmem:[#allocation2 + $0x1e8] sm:$0xff]  ;;  %v983_v51 = vpack.c.bf16 %v919_v45, %v919_v45 }
  0xfe   :  { %1063 = vst.msk [vmem:[%s2001_s3 + $0x70] sm:$0xf] %vm1034_vm2, %v998_v33  ;;  %v903_v49 = vadd.f32 %v1555_v39, %v835_v47  ;;  %v788_v50 = vld [vmem:[#allocation2 + $0x70] sm:$0xff]  ;;  %v999_v39 = vpack.c.bf16 %v935_v48, %v935_v48 }
  0xff   :  { %1079 = vst.msk [vmem:[%s2001_s3 + $0xb0] sm:$0xf] %vm1034_vm2, %v1014_v36  ;;  %v951_v53 = vmax.f32 %v887_v46, 0.0  ;;  %v856_v55 = vadd.f32 %v1300_v54, %v788_v50 }
 0x100   :  { %1095 = vst.msk [vmem:[%s2001_s3 + $0xf0] sm:$0xf] %vm1034_vm2, %v1030_v28  ;;  %v967_v57 = vmax.f32 %v903_v49, 0.0 }
 0x101   :  { %1048 = vst.msk [vmem:[%s2001_s3 + $0x34] sm:$0xf] %vm1034_vm2, %v983_v51  ;;  %v1015_v59 = vpack.c.bf16 %v951_v53, %v951_v53  ;;  %v920_v60 = vmax.f32 %v856_v55, 0.0 }
 0x102   :  { %1064 = vst.msk [vmem:[%s2001_s3 + $0x74] sm:$0xf] %vm1034_vm2, %v999_v39  ;;  %v1031_v62 = vpack.c.bf16 %v967_v57, %v967_v57  ;;  %v600_v7 = vpop.f32.mrf.mxu2  ;;  %v640_v11 = vpop.f32.mrf.mxu3 }
 0x103   :  { %1080 = vst.msk [vmem:[%s2001_s3 + $0xb4] sm:$0xf] %vm1034_vm2, %v1015_v59  ;;  %v984_v2 = vpack.c.bf16 %v920_v60, %v920_v60  ;;  %v690_v12 = vadd.f32 %v600_v7, %v131_v6  ;;  %v706_v13 = vadd.f32 %v640_v11, %v147_v9 }
 0x104   :  { %1096 = vst.msk [vmem:[%s2001_s3 + $0xf4] sm:$0xf] %vm1034_vm2, %v1031_v62 }
 0x105   :  { %1049 = vst.msk [vmem:[%s2001_s3 + $0x38] sm:$0xf] %vm1034_vm2, %v984_v2 }
 0x106   :  { %737 = vst.msk [vmem:[#allocation2 + $0xf0] sm:$0xff] %vm19_vm1, %v673_v63 }
 0x107   :  { %753 = vst.msk [vmem:[#allocation2 + $0x170] sm:$0xff] %vm19_vm1, %v689_v3 }
 0x108   :  { %769 = vst.msk [vmem:[#allocation2 + $0x1f0] sm:$0xff] %vm19_vm1, %v705_v5 }
 0x109   :  { %722 = vst.msk [vmem:[#allocation2 + $0x78] sm:$0xff] %vm19_vm1, %v658_v8 }
 0x10a   :  { %738 = vst.msk [vmem:[#allocation2 + $0xf8] sm:$0xff] %vm19_vm1, %v674_v10 }
 0x10b   :  { %754 = vst.msk [vmem:[#allocation2 + $0x178] sm:$0xff] %vm19_vm1, %v690_v12 }
 0x10c   :  { %770 = vst.msk [vmem:[#allocation2 + $0x1f8] sm:$0xff] %vm19_vm1, %v706_v13 }
 0x10d   :  { %v804_v14 = vld [vmem:[#allocation2 + $0xf0] sm:$0xff] }
 0x10e   :  { %v872_v17 = vadd.f32 %v1300_v54, %v804_v14  ;;  %v820_v15 = vld [vmem:[#allocation2 + $0x170] sm:$0xff] }
 0x10f   :  { %v888_v18 = vadd.f32 %v1300_v54, %v820_v15  ;;  %v836_v16 = vld [vmem:[#allocation2 + $0x1f0] sm:$0xff] }
 0x110   :  { %v936_v19 = vmax.f32 %v872_v17, 0.0  ;;  %v904_v20 = vadd.f32 %v1300_v54, %v836_v16  ;;  %v789_v21 = vld [vmem:[#allocation2 + $0x78] sm:$0xff] }
 0x111   :  { %v952_v22 = vmax.f32 %v888_v18, 0.0  ;;  %v857_v24 = vadd.f32 %v1300_v54, %v789_v21  ;;  %v805_v25 = vld [vmem:[#allocation2 + $0xf8] sm:$0xff] }
 0x112   :  { %v1000_v26 = vpack.c.bf16 %v936_v19, %v936_v19  ;;  %v968_v29 = vmax.f32 %v904_v20, 0.0  ;;  %v873_v30 = vadd.f32 %v1300_v54, %v805_v25  ;;  %v821_v31 = vld [vmem:[#allocation2 + $0x178] sm:$0xff] }
 0x113   :  { %v1016_v32 = vpack.c.bf16 %v952_v22, %v952_v22  ;;  %v921_v34 = vmax.f32 %v857_v24, 0.0  ;;  %v889_v23 = vadd.f32 %v1300_v54, %v821_v31  ;;  %v837_v35 = vld [vmem:[#allocation2 + $0x1f8] sm:$0xff] }
 0x114   :  { %1065 = vst.msk [vmem:[%s2001_s3 + $0x78] sm:$0xf] %vm1034_vm2, %v1000_v26  ;;  %v1032_v37 = vpack.c.bf16 %v968_v29, %v968_v29  ;;  %v937_v27 = vmax.f32 %v873_v30, 0.0  ;;  %v905_v38 = vadd.f32 %v1300_v54, %v837_v35 }
 0x115   :  { %1081 = vst.msk [vmem:[%s2001_s3 + $0xb8] sm:$0xf] %vm1034_vm2, %v1016_v32  ;;  %v985_v40 = vpack.c.bf16 %v921_v34, %v921_v34  ;;  %v953_v41 = vmax.f32 %v889_v23, 0.0 }
 0x116   :  { %1097 = vst.msk [vmem:[%s2001_s3 + $0xf8] sm:$0xf] %vm1034_vm2, %v1032_v37  ;;  %v1001_v33 = vpack.c.bf16 %v937_v27, %v937_v27  ;;  %v969_v42 = vmax.f32 %v905_v38, 0.0 }
 0x117   :  { %1050 = vst.msk [vmem:[%s2001_s3 + $0x3c] sm:$0xf] %vm1034_vm2, %v985_v40  ;;  %v1017_v43 = vpack.c.bf16 %v953_v41, %v953_v41 }
 0x118   :  { %1066 = vst.msk [vmem:[%s2001_s3 + $0x7c] sm:$0xf] %vm1034_vm2, %v1001_v33  ;;  %v1033_v44 = vpack.c.bf16 %v969_v42, %v969_v42 }
 0x119   :  { %1082 = vst.msk [vmem:[%s2001_s3 + $0xbc] sm:$0xf] %vm1034_vm2, %v1017_v43 }
 0x11a   :  { %1098 = vst.msk [vmem:[%s2001_s3 + $0xfc] sm:$0xf] %vm1034_vm2, %v1033_v44 }

// kernel: bottleneck_forward.4
= control target key start
LH: loop header
LB: loop body
LE: loop exit
PB: predicated region body
PF: predicated region fallthrough
CT: control target
= control target key end

     0   :  { %s1850_s21 = smov 0   ;;  %s1852_s22 = smov 0   ;;  %s2227_s0 = inlined_call_operand.vmem [shape: bf16[2,9,9,4], index: 0, kind: input, shape index: {}]   ;;  %s2228_s1 = inlined_call_operand.vmem [shape: bf16[2,9,9,4], index: 1, kind: input, shape index: {}]   ;;  %s2229_s2 = inlined_call_operand.vmem [shape: bf16[2,9,9,4], index: 2, kind: input, shape index: {}]   ;;  %s2230_s3 = inlined_call_operand.vmem [shape: bf16[2,9,9,4], index: 3, kind: input, shape index: {}]   ;;  %s2231_s4 = inlined_call_operand.vmem [shape: bf16[9,4,4], index: 4, kind: input, shape index: {}]   ;;  %s2232_s5 = inlined_call_operand.vmem [shape: f32[1,4], index: 5, kind: input, shape index: {}]   ;;  %s2233_s6 = inlined_call_operand.vmem [shape: bf16[2,8,8,4], index: 6, kind: output, shape index: {}]  }
   0x1   :  { %s1854_s23 = smov 0  }
   0x2 LB: > { %s28_s24 = sadd.s32 1, %s1809_s22  ;;  %p1564_p0 = scmp.ge.s32.totalorder %s1813_s23, 1  ;;  %s1813_s23 = sphi %s1854_s23, %s16_s23   ;;  %s1809_s22 = sphi %s1852_s22, %s2237_s22   ;;  %s1805_s21 = sphi %s1850_s21, %s2236_s21  }
   0x3   : > { %p30_p1 = scmp.ge.s32.totalorder %s28_s24, 2  ;;  %p256_p2 = scmp.lt.s32.totalorder %s1813_s23, 3 }
   0x5   : > { %s2239_s24 = smov (%p30_p1, %s28_s24), 0  ;;  %p257_p3 = pnand %p1564_p0, %p256_p2 }
   0x6   : > { %p305_p4 = scmp.lt.s32.totalorder (!%p257_p3), %s1805_s21, 1 }
   0x7   : > { %260 = sbr.rel (%p257_p3) target bundleno = 302 (0x12e), region = 44 }
   0xc   : > { %v1595_v0 = vld [vmem:[%s2231_s4 + $0x2] sm:$0x3]  ;;  %vm460_vm0 = vcmask 1041408   ;;  %v1636_v2 = vld [vmem:[%s2231_s4 + $0x4] sm:$0x3]  ;;  %s2241_s21 = smov (!%p305_p4, %s1805_s21), 1 }
   0xd   : > { %v462_v1 = vsel %vm460_vm0, %v1595_v0, 0  ;;  %v1641_v3 = vld [vmem:[%s2231_s4 + $0x6] sm:$0x3]  ;;  %v699_v4 = vsel %vm460_vm0, %v1636_v2, 0  ;;  %v424_v6 = vld [vmem:[%s2231_s4] sm:$0x3] }
   0xe   : > { %1762 = vmatpush.bf16.msra.mxu1 %v462_v1  ;;  %1763 = vmatpush.bf16.msra.mxu2 %v462_v1  ;;  %v773_v5 = vsel %vm460_vm0, %v1641_v3, 0  ;;  %v526_v7 = vsel %vm460_vm0, %v424_v6, 0  ;;  %v1662_v8 = vld [vmem:[%s2231_s4 + $0x8] sm:$0x3]  ;;  %s1890_s11 = smul.u32 72, %s2241_s21  ;;  %vm447_vm1 = vcmask 31744  }
   0xf   : > { %1764 = vmatpush.bf16.msra.mxu3 %v462_v1  ;;  %471 = vmatpush.bf16.msra.mxu0 %v462_v1  ;;  %v847_v9 = vsel %vm460_vm0, %v1662_v8, 0  ;;  %v1688_v10 = vld [vmem:[%s2231_s4 + $0xc] sm:$0x3]  ;;  %v1709_v11 = vld [vmem:[%s2231_s4 + $0xe] sm:$0x3]  ;;  %s1737_s14 = sshll.u32 %s2241_s21, 5 }
  0x10   : > { %s1900_s16 = scalar_lea.vmem %s2228_s1, %s1890_s11  ;;  %v1683_v12 = vld [vmem:[%s2231_s4 + $0xa] sm:$0x3]  ;;  %s1912_s27 = scalar_lea.vmem %s2227_s0, %s1890_s11  ;;  %v1099_v24 = vsel %vm460_vm0, %v1688_v10, 0  ;;  %v1173_v28 = vsel %vm460_vm0, %v1709_v11, 0  ;;  %v1730_v38 = vld [vmem:[%s2231_s4 + $0x10] sm:$0x3] }
  0x11   : > { %v1602_v13 = vld [vmem:[%s1900_s16 + $0x10] sm:$0xf]  ;;  %v1743_v14 = vld [vmem:[%s1900_s16 + $0x14] sm:$0xf0]  ;;  %v1606_v15 = vld [vmem:[%s1900_s16 + $0x20] sm:$0xf]  ;;  %s1941_s8 = scalar_lea.vmem %s2229_s2, %s1890_s11  ;;  %s1954_s12 = scalar_lea.vmem %s2230_s3, %s1890_s11 }
  0x12   : > { %708 = vmatpush.bf16.msrb.mxu2 %v699_v4  ;;  %535 = vmatpush.bf16.msrb.mxu1 %v526_v7  ;;  %v1603_v16 = vor.u32 %v1743_v14, %v1602_v13  ;;  %v1744_v17 = vld [vmem:[%s1900_s16 + $0x24] sm:$0xf0]  ;;  %v1610_v18 = vld [vmem:[%s1900_s16 + $0x30] sm:$0xf]  ;;  %v1745_v19 = vld [vmem:[%s1900_s16 + $0x34] sm:$0xf0]  ;;  %s2171_s17 = scalar_lea.vmem %s2233_s6, %s1737_s14 }
  0x13   : > { %782 = vmatpush.bf16.msrb.mxu3 %v773_v5  ;;  %856 = vmatpush.bf16.msrb.mxu0 %v847_v9  ;;  %v1607_v20 = vor.u32 %v1744_v17, %v1606_v15  ;;  %v1611_v21 = vor.u32 %v1745_v19, %v1610_v18  ;;  %v1598_v22 = vld [vmem:[%s1900_s16] sm:$0xf]  ;;  %v1742_v23 = vld [vmem:[%s1900_s16 + $0x4] sm:$0xf0]  ;;  %v341_v27 = vld [vmem:[%s1912_s27 + $0x4] sm:$0x1] }
  0x14   : > { %1613 = vmatmul.msk.bf16.vlgmr.msra.gmra.mxu1 %vm447_vm1, %v1603_v16  ;;  %v1599_v25 = vor.u32 %v1742_v23, %v1598_v22  ;;  %v340_v26 = vld [vmem:[%s1912_s27] sm:$0xf]  ;;  %v1025_v29 = vsel %vm460_vm0, %v1683_v12, 0  ;;  %v342_v30 = vld [vmem:[%s1912_s27 + $0x8] sm:$0xf]  ;;  %v570_v34 = vshll.u32 %v341_v27, 16 }
  0x15   : > { %1614 = vmatmul.msk.bf16.vlgmr.msra.gmra.mxu2 %vm447_vm1, %v1607_v20  ;;  %1615 = vmatmul.msk.bf16.vlgmr.msra.gmra.mxu3 %vm447_vm1, %v1611_v21  ;;  %v343_v31 = vld [vmem:[%s1912_s27 + $0xc] sm:$0x1]  ;;  %v561_v32 = vshrl.u32 %v340_v26, 16  ;;  %v564_v33 = vshll.u32 %v340_v26, 16  ;;  %v575_v35 = vshrl.u32 %v342_v30, 16  ;;  %v578_v36 = vshll.u32 %v342_v30, 16 }
  0x16   : > { %1612 = vmatmul.msk.bf16.vlgmr.msra.gmra.mxu0 %vm447_vm1, %v1599_v25  ;;  %v584_v37 = vshll.u32 %v343_v31, 16  ;;  %1108 = vmatpush.bf16.msra.mxu2 %v1099_v24  ;;  %vm557_vm2 = vsmask.f32 3328  ;;  %vm558_vm3 = vsmask.f32 7440  ;;  %v572_v44 = vrot.slane %v570_v34, 5 }
  0x17   : > { %v563_v39 = vrot.slane %v561_v32, 4  ;;  %v566_v40 = vrot.slane %v564_v33, 5  ;;  %1182 = vmatpush.bf16.msra.mxu3 %v1173_v28  ;;  %1034 = vmatpush.bf16.msra.mxu1 %v1025_v29  ;;  %v577_v41 = vrot.slane %v575_v35, 4  ;;  %v580_v42 = vrot.slane %v578_v36, 5  ;;  %vm1943_vm4 = vmor %vm557_vm2, %vm558_vm3  ;;  %v344_v49 = vld [vmem:[%s1912_s27 + $0x10] sm:$0xf] }
  0x18   : > { %v1351_v45 = vsel %vm460_vm0, %v1730_v38, 0  ;;  %v586_v48 = vrot.slane %v584_v37, 5  ;;  %v346_v50 = vld [vmem:[%s1912_s27 + $0x18] sm:$0xf]  ;;  %v1618_v51 = vld [vmem:[%s1912_s27] sm:$0xf] }
  0x19   : > { %v567_v43 = vor.u32 %v566_v40, %v563_v39  ;;  %v581_v47 = vor.u32 %v580_v42, %v577_v41  ;;  %1360 = vmatpush.bf16.msra.mxu0 %v1351_v45  ;;  %v589_v53 = vshrl.u32 %v344_v49, 16  ;;  %v592_v54 = vshll.u32 %v344_v49, 16  ;;  %v1738_v55 = vld [vmem:[%s1912_s27 + $0x4] sm:$0xf0]  ;;  %v1644_v60 = vld [vmem:[%s1941_s8] sm:$0xf] }
  0x1a   : > { %v603_v57 = vshrl.u32 %v346_v50, 16  ;;  %v606_v58 = vshll.u32 %v346_v50, 16  ;;  %v1746_v61 = vld [vmem:[%s1941_s8 + $0x4] sm:$0xf0]  ;;  %v1665_v2 = vld [vmem:[%s1954_s12] sm:$0xf]  ;;  %v1619_v9 = vor.u32 %v1738_v55, %v1618_v51 }
  0x1b   : > { %v568_v52 = vrot.slane %v567_v43, 4  ;;  %v582_v56 = vrot.slane %v581_v47, 4  ;;  %v591_v62 = vrot.slane %v589_v53, 4  ;;  %v594_v63 = vrot.slane %v592_v54, 5  ;;  %v1750_v3 = vld [vmem:[%s1954_s12 + $0x4] sm:$0xf0] }
  0x1c   : > { %v605_v4 = vrot.slane %v603_v57, 4  ;;  %v608_v5 = vrot.slane %v606_v58, 5  ;;  %v345_v7 = vld [vmem:[%s1912_s27 + $0x14] sm:$0x1]  ;;  %v347_v8 = vld [vmem:[%s1912_s27 + $0x1c] sm:$0x1]  ;;  %v1645_v11 = vor.u32 %v1746_v61, %v1644_v60  ;;  %v1666_v12 = vor.u32 %v1750_v3, %v1665_v2 }
  0x1d   : > { %v573_v59 = vsel %vm1943_vm4, %v568_v52, %v572_v44  ;;  %v587_v0 = vsel %vm1943_vm4, %v582_v56, %v586_v48  ;;  %v595_v13 = vor.u32 %v594_v63, %v591_v62  ;;  %v598_v14 = vshll.u32 %v345_v7, 16  ;;  %v348_v21 = vld [vmem:[%s1912_s27 + $0x20] sm:$0xf]  ;;  %v350_v22 = vld [vmem:[%s1912_s27 + $0x28] sm:$0xf] }
  0x1e   : > { %v674_v1 = vunpack.c.l.b16 %v573_v59  ;;  %v675_v6 = vunpack.c.l.b16 %v587_v0  ;;  %v609_v15 = vor.u32 %v608_v5, %v605_v4  ;;  %v612_v16 = vshll.u32 %v347_v8, 16  ;;  %v1622_v29 = vld [vmem:[%s1912_s27 + $0x10] sm:$0xf]  ;;  %v1739_v30 = vld [vmem:[%s1912_s27 + $0x14] sm:$0xf0] }
  0x1f   : > { %v596_v17 = vrot.slane %v595_v13, 4  ;;  %v600_v18 = vrot.slane %v598_v14, 5  ;;  %v617_v23 = vshrl.u32 %v348_v21, 16  ;;  %v620_v24 = vshll.u32 %v348_v21, 16  ;;  %v1648_v33 = vld [vmem:[%s1941_s8 + $0x10] sm:$0xf] }
  0x20   : > { %v682_v10 = vpack.c.b16 %v675_v6, %v674_v1  ;;  %v610_v19 = vrot.slane %v609_v15, 4  ;;  %v614_v20 = vrot.slane %v612_v16, 5  ;;  %v631_v27 = vshrl.u32 %v350_v22, 16  ;;  %v1747_v34 = vld [vmem:[%s1941_s8 + $0x14] sm:$0xf0] }
  0x21   : > { %v601_v25 = vsel %vm1943_vm4, %v596_v17, %v600_v18  ;;  %v634_v28 = vshll.u32 %v350_v22, 16  ;;  %v1669_v35 = vld [vmem:[%s1954_s12 + $0x10] sm:$0xf]  ;;  %v1751_v36 = vld [vmem:[%s1954_s12 + $0x14] sm:$0xf0]  ;;  %v619_v37 = vrot.slane %v617_v23, 4  ;;  %v1623_v43 = vor.u32 %v1739_v30, %v1622_v29 }
  0x22   : > { %v615_v26 = vsel %vm1943_vm4, %v610_v19, %v614_v20  ;;  %v676_v31 = vunpack.c.l.b16 %v601_v25  ;;  %v622_v38 = vrot.slane %v620_v24, 5  ;;  %v633_v39 = vrot.slane %v631_v27, 4  ;;  %v349_v41 = vld [vmem:[%s1912_s27 + $0x24] sm:$0x1]  ;;  %v351_v42 = vld [vmem:[%s1912_s27 + $0x2c] sm:$0x1] }
  0x23   : > { %v677_v32 = vunpack.c.l.b16 %v615_v26  ;;  %v636_v40 = vrot.slane %v634_v28, 5  ;;  %v1649_v45 = vor.u32 %v1747_v34, %v1648_v33  ;;  %v1670_v47 = vor.u32 %v1751_v36, %v1669_v35  ;;  %v352_v52 = vld [vmem:[%s1912_s27 + $0x30] sm:$0xf]  ;;  %v354_v53 = vld [vmem:[%s1912_s27 + $0x38] sm:$0xf] }
  0x24   : > { %1632 = vmatmul.msk.bf16.vlgmr.msrb.gmra.mxu1 %vm447_vm1, %v1619_v9  ;;  %v623_v48 = vor.u32 %v622_v38, %v619_v37  ;;  %v626_v49 = vshll.u32 %v349_v41, 16  ;;  %v640_v51 = vshll.u32 %v351_v42, 16  ;;  %v645_v58 = vshrl.u32 %v352_v52, 16  ;;  %v353_v4 = vld [vmem:[%s1912_s27 + $0x34] sm:$0x1] }
  0x25   : > { %1637 = vmatmul.msk.bf16.vlgmr.msrb.gmra.mxu2 %vm447_vm1, %v682_v10  ;;  %1658 = vmatmul.msk.bf16.vlgmr.msrb.gmra.mxu3 %vm447_vm1, %v1645_v11  ;;  %v683_v44 = vpack.c.b16 %v677_v32, %v676_v31  ;;  %v637_v50 = vor.u32 %v636_v40, %v633_v39  ;;  %v648_v59 = vshll.u32 %v352_v52, 16  ;;  %v659_v60 = vshrl.u32 %v354_v53, 16  ;;  %v355_v5 = vld [vmem:[%s1912_s27 + $0x3c] sm:$0x1]  ;;  %v1626_v6 = vld [vmem:[%s1912_s27 + $0x20] sm:$0xf] }
  0x26   : > { %1679 = vmatmul.msk.bf16.vlgmr.msrb.gmra.mxu0 %vm447_vm1, %v1666_v12  ;;  %v624_v54 = vrot.slane %v623_v48, 4  ;;  %v628_v55 = vrot.slane %v626_v49, 5  ;;  %v642_v57 = vrot.slane %v640_v51, 5  ;;  %v662_v61 = vshll.u32 %v354_v53, 16  ;;  %v1740_v7 = vld [vmem:[%s1912_s27 + $0x24] sm:$0xf0] }
  0x27   : > { %v638_v56 = vrot.slane %v637_v50, 4  ;;  %v647_v0 = vrot.slane %v645_v58, 4  ;;  %v650_v1 = vrot.slane %v648_v59, 5  ;;  %v661_v2 = vrot.slane %v659_v60, 4  ;;  %v1652_v10 = vld [vmem:[%s1941_s8 + $0x20] sm:$0xf] }
  0x28   : > { %v629_v62 = vsel %vm1943_vm4, %v624_v54, %v628_v55  ;;  %v664_v3 = vrot.slane %v662_v61, 5  ;;  %v1748_v11 = vld [vmem:[%s1941_s8 + $0x24] sm:$0xf0]  ;;  %v1673_v12 = vld [vmem:[%s1954_s12 + $0x20] sm:$0xf]  ;;  %v654_v15 = vshll.u32 %v353_v4, 16  ;;  %v1627_v18 = vor.u32 %v1740_v7, %v1626_v6 }
  0x29   : > { %v643_v63 = vsel %vm1943_vm4, %v638_v56, %v642_v57  ;;  %v678_v8 = vunpack.c.l.b16 %v629_v62  ;;  %v1752_v13 = vld [vmem:[%s1954_s12 + $0x24] sm:$0xf0]  ;;  %v651_v14 = vor.u32 %v650_v1, %v647_v0  ;;  %v668_v17 = vshll.u32 %v355_v5, 16  ;;  %v368_v26 = vld [vmem:[%s1941_s8] sm:$0xf] }
  0x2a   : > { %v679_v9 = vunpack.c.l.b16 %v643_v63  ;;  %v665_v16 = vor.u32 %v664_v3, %v661_v2  ;;  %v1653_v20 = vor.u32 %v1748_v11, %v1652_v10  ;;  %v1674_v21 = vor.u32 %v1752_v13, %v1673_v12  ;;  %v370_v27 = vld [vmem:[%s1941_s8 + $0x8] sm:$0xf]  ;;  %v1573_v29 = vld [vmem:[%s1912_s27 + $0x10] sm:$0xf]  ;;  %v1741_v41 = vld [vmem:[%s1912_s27 + $0x34] sm:$0xf0] }
  0x2b   : > { %v652_v22 = vrot.slane %v651_v14, 4  ;;  %v656_v23 = vrot.slane %v654_v15, 5  ;;  %v670_v25 = vrot.slane %v668_v17, 5  ;;  %v1571_v28 = vld [vmem:[%s1912_s27 + $0x8] sm:$0xf]  ;;  %v887_v32 = vshrl.u32 %v368_v26, 16 }
  0x2c   : > { %v684_v19 = vpack.c.b16 %v679_v9, %v678_v8  ;;  %v666_v24 = vrot.slane %v665_v16, 4  ;;  %v890_v33 = vshll.u32 %v368_v26, 16  ;;  %v901_v34 = vshrl.u32 %v370_v27, 16  ;;  %v1630_v40 = vld [vmem:[%s1912_s27 + $0x30] sm:$0xf] }
  0x2d   : > { %v657_v30 = vsel %vm1943_vm4, %v652_v22, %v656_v23  ;;  %v904_v35 = vshll.u32 %v370_v27, 16  ;;  %v1213_v36 = vshrl.u32 %v1571_v28, 16  ;;  %v1216_v37 = vshll.u32 %v1571_v28, 16  ;;  %v371_v52 = vld [vmem:[%s1941_s8 + $0xc] sm:$0x1] }
  0x2e   : > { %v671_v31 = vsel %vm1943_vm4, %v666_v24, %v670_v25  ;;  %v1227_v38 = vshrl.u32 %v1573_v29, 16  ;;  %v1230_v39 = vshll.u32 %v1573_v29, 16  ;;  %v680_v42 = vunpack.c.l.b16 %v657_v30  ;;  %v1572_v57 = vld [vmem:[%s1912_s27 + $0xc] sm:$0x1]  ;;  %v1574_v58 = vld [vmem:[%s1912_s27 + $0x14] sm:$0x1] }
  0x2f   : > { %v889_v48 = vrot.slane %v887_v32, 4  ;;  %v892_v49 = vrot.slane %v890_v33, 5  ;;  %v903_v50 = vrot.slane %v901_v34, 4  ;;  %v906_v51 = vrot.slane %v904_v35, 5  ;;  %v1677_v62 = vld [vmem:[%s1954_s12 + $0x30] sm:$0xf] }
  0x30   : > { %v1215_v53 = vrot.slane %v1213_v36, 4  ;;  %v1218_v54 = vrot.slane %v1216_v37, 5  ;;  %v1229_v55 = vrot.slane %v1227_v38, 4  ;;  %v1232_v56 = vrot.slane %v1230_v39, 5  ;;  %v1753_v63 = vld [vmem:[%s1954_s12 + $0x34] sm:$0xf0] }
  0x31   : > { %v1631_v59 = vor.u32 %v1741_v41, %v1630_v40  ;;  %v893_v0 = vor.u32 %v892_v49, %v889_v48  ;;  %v907_v2 = vor.u32 %v906_v51, %v903_v50  ;;  %v910_v3 = vshll.u32 %v371_v52, 16  ;;  %v372_v9 = vld [vmem:[%s1941_s8 + $0x10] sm:$0xf]  ;;  %v374_v10 = vld [vmem:[%s1941_s8 + $0x18] sm:$0xf] }
  0x32   : > { %v1219_v4 = vor.u32 %v1218_v54, %v1215_v53  ;;  %v1222_v5 = vshll.u32 %v1572_v57, 16  ;;  %v1233_v6 = vor.u32 %v1232_v56, %v1229_v55  ;;  %v1236_v7 = vshll.u32 %v1574_v58, 16  ;;  %v1575_v23 = vld [vmem:[%s1912_s27 + $0x18] sm:$0xf]  ;;  %v1577_v24 = vld [vmem:[%s1912_s27 + $0x20] sm:$0xf] }
  0x33   : > { %v1678_v8 = vor.u32 %v1753_v63, %v1677_v62  ;;  %v894_v11 = vrot.slane %v893_v0, 4  ;;  %v908_v13 = vrot.slane %v907_v2, 4  ;;  %v912_v14 = vrot.slane %v910_v3, 5  ;;  %v373_v29 = vld [vmem:[%s1941_s8 + $0x14] sm:$0x1] }
  0x34   : > { %1633 = vmatmul.msk.bf16.gmra.mxu1 %vm447_vm1, %v1623_v43  ;;  %v681_v43 = vunpack.c.l.b16 %v671_v31  ;;  %v1220_v15 = vrot.slane %v1219_v4, 4  ;;  %v1224_v16 = vrot.slane %v1222_v5, 5  ;;  %v1234_v17 = vrot.slane %v1233_v6, 4  ;;  %v375_v34 = vld [vmem:[%s1941_s8 + $0x1c] sm:$0x1] }
  0x35   : > { %1638 = vmatmul.msk.bf16.gmra.mxu2 %vm447_vm1, %v683_v44  ;;  %1659 = vmatmul.msk.bf16.gmra.mxu3 %vm447_vm1, %v1649_v45  ;;  %v1656_v44 = vld [vmem:[%s1941_s8 + $0x30] sm:$0xf]  ;;  %v1749_v45 = vld [vmem:[%s1941_s8 + $0x34] sm:$0xf0]  ;;  %v932_v22 = vshll.u32 %v374_v10, 16  ;;  %v913_v26 = vsel %vm1943_vm4, %v908_v13, %v912_v14  ;;  %v1241_v35 = vshrl.u32 %v1575_v23, 16 }
  0x36   : > { %1680 = vmatmul.msk.bf16.gmra.mxu0 %vm447_vm1, %v1670_v47  ;;  %v369_v47 = vld [vmem:[%s1941_s8 + $0x4] sm:$0x1]  ;;  %v685_v60 = vpack.c.b16 %v681_v43, %v680_v42  ;;  %v1657_v61 = vor.u32 %v1749_v45, %v1656_v44  ;;  %v1225_v27 = vsel %vm1943_vm4, %v1220_v15, %v1224_v16  ;;  %v1244_v36 = vshll.u32 %v1575_v23, 16  ;;  %v1691_v41 = vld [vmem:[%s1912_s27 + $0x8] sm:$0xf] }
  0x37   : > { %v896_v1 = vshll.u32 %v369_v47, 16  ;;  %v934_v33 = vrot.slane %v932_v22, 5  ;;  %v1255_v37 = vshrl.u32 %v1577_v24, 16  ;;  %v1258_v38 = vshll.u32 %v1577_v24, 16  ;;  %v1754_v42 = vld [vmem:[%s1912_s27 + $0xc] sm:$0xf0] }
  0x38   : > { %v1001_v40 = vunpack.c.l.b16 %v913_v26  ;;  %v1326_v43 = vunpack.c.l.b16 %v1225_v27  ;;  %v1712_v45 = vld [vmem:[%s1900_s16 + $0x8] sm:$0xf]  ;;  %v1758_v47 = vld [vmem:[%s1900_s16 + $0xc] sm:$0xf0]  ;;  %v924_v49 = vshll.u32 %v373_v29, 16  ;;  %v938_v51 = vshll.u32 %v375_v34, 16 }
  0x39   : > { %v898_v12 = vrot.slane %v896_v1, 5  ;;  %v1243_v52 = vrot.slane %v1241_v35, 4  ;;  %v1246_v53 = vrot.slane %v1244_v36, 5  ;;  %v1257_v54 = vrot.slane %v1255_v37, 4  ;;  %v1576_v57 = vld [vmem:[%s1912_s27 + $0x1c] sm:$0x1] }
  0x3a   : > { %v1260_v55 = vrot.slane %v1258_v38, 5  ;;  %v1578_v58 = vld [vmem:[%s1912_s27 + $0x24] sm:$0x1]  ;;  %v926_v63 = vrot.slane %v924_v49, 5  ;;  %v940_v1 = vrot.slane %v938_v51, 5  ;;  %v1250_v3 = vshll.u32 %v1576_v57, 16 }
  0x3b   : > { %v899_v25 = vsel %vm1943_vm4, %v894_v11, %v898_v12  ;;  %v1247_v2 = vor.u32 %v1246_v53, %v1243_v52  ;;  %v1264_v5 = vshll.u32 %v1578_v58, 16  ;;  %v376_v6 = vld [vmem:[%s1941_s8 + $0x20] sm:$0xf]  ;;  %v1581_v15 = vld [vmem:[%s1912_s27 + $0x30] sm:$0xf]  ;;  %vm1418_vm5 = vcmask 27648  }
  0x3c   : > { %v1000_v39 = vunpack.c.l.b16 %v899_v25  ;;  %v1261_v4 = vor.u32 %v1260_v55, %v1257_v54  ;;  %v1252_v12 = vrot.slane %v1250_v3, 5  ;;  %v943_v16 = vshrl.u32 %v376_v6, 16  ;;  %v1755_v29 = vld [vmem:[%s1912_s27 + $0x1c] sm:$0xf0]  ;;  %v377_v35 = vld [vmem:[%s1941_s8 + $0x24] sm:$0x1] }
  0x3d   : > { %v1248_v11 = vrot.slane %v1247_v2, 4  ;;  %v1266_v14 = vrot.slane %v1264_v5, 5  ;;  %v1283_v22 = vshrl.u32 %v1581_v15, 16  ;;  %v1286_v23 = vshll.u32 %v1581_v15, 16  ;;  %v379_v36 = vld [vmem:[%s1941_s8 + $0x2c] sm:$0x1] }
  0x3e   : > { %v1008_v56 = vpack.c.b16 %v1001_v40, %v1000_v39  ;;  %v1262_v13 = vrot.slane %v1261_v4, 4  ;;  %v1759_v39 = vld [vmem:[%s1900_s16 + $0x1c] sm:$0xf0]  ;;  %v952_v49 = vshll.u32 %v377_v35, 16  ;;  %v966_v51 = vshll.u32 %v379_v36, 16 }
  0x3f   : > { %v1253_v26 = vsel %vm1943_vm4, %v1248_v11, %v1252_v12  ;;  %v380_v3 = vld [vmem:[%s1941_s8 + $0x30] sm:$0xf]  ;;  %v382_v4 = vld [vmem:[%s1941_s8 + $0x38] sm:$0xf] }
  0x40   : > { %v1267_v27 = vsel %vm1943_vm4, %v1262_v13, %v1266_v14  ;;  %v1328_v40 = vunpack.c.l.b16 %v1253_v26  ;;  %v985_v11 = vshrl.u32 %v382_v4, 16  ;;  %v988_v12 = vshll.u32 %v382_v4, 16  ;;  %v1724_v4 = vld [vmem:[%s1900_s16 + $0x38] sm:$0xf] }
  0x44   : > { %1634 = vmatmul.msk.bf16.gmra.mxu1 %vm447_vm1, %v1627_v18  ;;  %v1238_v18 = vrot.slane %v1236_v7, 5  ;;  %v378_v7 = vld [vmem:[%s1941_s8 + $0x28] sm:$0xf] }
  0x45   : > { %1639 = vmatmul.msk.bf16.gmra.mxu2 %vm447_vm1, %v684_v19  ;;  %1660 = vmatmul.msk.bf16.gmra.mxu3 %vm447_vm1, %v1653_v20  ;;  %v915_v19 = vshrl.u32 %v372_v9, 16  ;;  %v918_v20 = vshll.u32 %v372_v9, 16 }
  0x46   : > { %1681 = vmatmul.msk.bf16.gmra.mxu0 %vm447_vm1, %v1674_v21  ;;  %v929_v21 = vshrl.u32 %v374_v10, 16  ;;  %v1239_v28 = vsel %vm1943_vm4, %v1234_v17, %v1238_v18  ;;  %v1579_v10 = vld [vmem:[%s1912_s27 + $0x28] sm:$0xf]  ;;  %v946_v17 = vshll.u32 %v376_v6, 16  ;;  %v957_v18 = vshrl.u32 %v378_v7, 16 }
  0x47   : > { %v917_v30 = vrot.slane %v915_v19, 4  ;;  %v920_v31 = vrot.slane %v918_v20, 5  ;;  %v1327_v44 = vunpack.c.l.b16 %v1239_v28  ;;  %v960_v19 = vshll.u32 %v378_v7, 16  ;;  %v1695_v28 = vld [vmem:[%s1912_s27 + $0x18] sm:$0xf] }
  0x48   : > { %v931_v32 = vrot.slane %v929_v21, 4  ;;  %v1269_v20 = vshrl.u32 %v1579_v10, 16  ;;  %v1272_v21 = vshll.u32 %v1579_v10, 16  ;;  %v1696_v52 = vor.u32 %v1755_v29, %v1695_v28  ;;  %v1583_v7 = vld [vmem:[%s1912_s27 + $0x38] sm:$0xf] }
  0x49   : > { %v921_v48 = vor.u32 %v920_v31, %v917_v30  ;;  %v1716_v30 = vld [vmem:[%s1900_s16 + $0x18] sm:$0xf]  ;;  %v945_v31 = vrot.slane %v943_v16, 4  ;;  %v962_v34 = vrot.slane %v960_v19, 5  ;;  %v974_v10 = vshll.u32 %v380_v3, 16 }
  0x4a   : > { %v935_v50 = vor.u32 %v934_v33, %v931_v32  ;;  %v948_v32 = vrot.slane %v946_v17, 5  ;;  %v959_v33 = vrot.slane %v957_v18, 4  ;;  %v1271_v37 = vrot.slane %v1269_v20, 4 }
  0x4b   : > { %v922_v62 = vrot.slane %v921_v48, 4  ;;  %v1274_v38 = vrot.slane %v1272_v21, 5  ;;  %v1717_v53 = vor.u32 %v1759_v39, %v1716_v30  ;;  %v1297_v15 = vshrl.u32 %v1583_v7, 16  ;;  %v1699_v21 = vld [vmem:[%s1912_s27 + $0x28] sm:$0xf] }
  0x4c   : > { %v936_v0 = vrot.slane %v935_v50, 4  ;;  %v949_v48 = vor.u32 %v948_v32, %v945_v31  ;;  %v963_v50 = vor.u32 %v962_v34, %v959_v33  ;;  %v1300_v16 = vshll.u32 %v1583_v7, 16  ;;  %v381_v31 = vld [vmem:[%s1941_s8 + $0x34] sm:$0x1]  ;;  %v383_v32 = vld [vmem:[%s1941_s8 + $0x3c] sm:$0x1] }
  0x4d   : > { %v1275_v54 = vor.u32 %v1274_v38, %v1271_v37  ;;  %v976_v26 = vrot.slane %v974_v10, 5  ;;  %v990_v28 = vrot.slane %v988_v12, 5  ;;  %v1299_v33 = vrot.slane %v1297_v15, 4 }
  0x4e   : > { %v941_v9 = vsel %vm1943_vm4, %v936_v0, %v940_v1  ;;  %v1302_v34 = vrot.slane %v1300_v16, 5 }
  0x4f   : > { %v1003_v25 = vunpack.c.l.b16 %v941_v9  ;;  %v971_v9 = vshrl.u32 %v380_v3, 16  ;;  %v1757_v3 = vld [vmem:[%s1912_s27 + $0x3c] sm:$0xf0] }
  0x54   : > { %1635 = vmatmul.msk.bf16.gmra.mxu1 %vm447_vm1, %v1631_v59  ;;  %v1692_v59 = vor.u32 %v1754_v42, %v1691_v41  ;;  %v1329_v41 = vunpack.c.l.b16 %v1267_v27  ;;  %v1580_v42 = vld [vmem:[%s1912_s27 + $0x2c] sm:$0x1]  ;;  %v987_v27 = vrot.slane %v985_v11, 4 }
  0x55   : > { %1640 = vmatmul.msk.bf16.gmra.mxu2 %vm447_vm1, %v685_v60  ;;  %1661 = vmatmul.msk.bf16.gmra.mxu3 %vm447_vm1, %v1657_v61  ;;  %v1713_v60 = vor.u32 %v1758_v47, %v1712_v45  ;;  %v1334_v61 = vpack.c.b16 %v1327_v44, %v1326_v43  ;;  %v1285_v43 = vrot.slane %v1283_v22, 4  ;;  %v1288_v44 = vrot.slane %v1286_v23, 5  ;;  %v1582_v47 = vld [vmem:[%s1912_s27 + $0x34] sm:$0x1]  ;;  %v1756_v22 = vld [vmem:[%s1912_s27 + $0x2c] sm:$0xf0] }
  0x56   : > { %1682 = vmatmul.msk.bf16.gmra.mxu0 %vm447_vm1, %v1678_v8  ;;  %v927_v8 = vsel %vm1943_vm4, %v922_v62, %v926_v63  ;;  %v1278_v55 = vshll.u32 %v1580_v42, 16  ;;  %v1292_v58 = vshll.u32 %v1582_v47, 16  ;;  %v968_v62 = vrot.slane %v966_v51, 5  ;;  %v1720_v23 = vld [vmem:[%s1900_s16 + $0x28] sm:$0xf] }
  0x57   : > { %v1002_v24 = vunpack.c.l.b16 %v927_v8  ;;  %v1289_v57 = vor.u32 %v1288_v44, %v1285_v43  ;;  %v1276_v63 = vrot.slane %v1275_v54, 4  ;;  %v1585_v8 = vld [vmem:[%s1912_s27 + $0x40] sm:$0xf]  ;;  %v1700_v38 = vor.u32 %v1756_v22, %v1699_v21 }
  0x58   : > { %v1280_v0 = vrot.slane %v1278_v55, 5  ;;  %v1294_v2 = vrot.slane %v1292_v58, 5  ;;  %v1311_v17 = vshrl.u32 %v1585_v8, 16  ;;  %v1314_v18 = vshll.u32 %v1585_v8, 16 }
  0x59   : > { %v1009_v45 = vpack.c.b16 %v1003_v25, %v1002_v24  ;;  %v1290_v1 = vrot.slane %v1289_v57, 4  ;;  %v1760_v24 = vld [vmem:[%s1900_s16 + $0x2c] sm:$0xf0]  ;;  %v973_v25 = vrot.slane %v971_v9, 4  ;;  %v980_v43 = vshll.u32 %v381_v31, 16 }
  0x5a   : > { %v1281_v13 = vsel %vm1943_vm4, %v1276_v63, %v1280_v0  ;;  %v1313_v35 = vrot.slane %v1311_v17, 4  ;;  %v1316_v36 = vrot.slane %v1314_v18, 5  ;;  %v1721_v39 = vor.u32 %v1760_v24, %v1720_v23 }
  0x5b   : > { %v1295_v14 = vsel %vm1943_vm4, %v1290_v1, %v1294_v2  ;;  %v1330_v29 = vunpack.c.l.b16 %v1281_v13  ;;  %v977_v42 = vor.u32 %v976_v26, %v973_v25  ;;  %v991_v44 = vor.u32 %v990_v28, %v987_v27  ;;  %v1703_v2 = vld [vmem:[%s1912_s27 + $0x38] sm:$0xf] }
  0x5c   : > { %v1331_v30 = vunpack.c.l.b16 %v1295_v14  ;;  %v1704_v10 = vor.u32 %v1757_v3, %v1703_v2 }
  0x5d   : > { %v992_v54 = vrot.slane %v991_v44, 4 }
  0x5e   : > { %v1336_v47 = vpack.c.b16 %v1331_v30, %v1330_v29 }
  0x64   : > { %1684 = vmatmul.msk.bf16.vlgmr.msra.gmra.mxu1 %vm447_vm1, %v1008_v56  ;;  %v1335_v56 = vpack.c.b16 %v1329_v41, %v1328_v40  ;;  %v1584_v40 = vld [vmem:[%s1912_s27 + $0x3c] sm:$0x1]  ;;  %v1586_v41 = vld [vmem:[%s1912_s27 + $0x44] sm:$0x1] }
  0x65   : > { %1705 = vmatmul.msk.bf16.vlgmr.msra.gmra.mxu2 %vm447_vm1, %v1692_v59  ;;  %1726 = vmatmul.msk.bf16.vlgmr.msra.gmra.mxu3 %vm447_vm1, %v1713_v60  ;;  %v950_v59 = vrot.slane %v949_v48, 4  ;;  %v954_v60 = vrot.slane %v952_v49, 5  ;;  %v1303_v48 = vor.u32 %v1302_v34, %v1299_v33  ;;  %v1306_v49 = vshll.u32 %v1584_v40, 16 }
  0x66   : > { %1731 = vmatmul.msk.bf16.vlgmr.msra.gmra.mxu0 %vm447_vm1, %v1334_v61  ;;  %v964_v61 = vrot.slane %v963_v50, 4  ;;  %v1317_v50 = vor.u32 %v1316_v36, %v1313_v35  ;;  %v1320_v51 = vshll.u32 %v1586_v41, 16 }
  0x67   : > { %v955_v5 = vsel %vm1943_vm4, %v950_v59, %v954_v60  ;;  %v1308_v57 = vrot.slane %v1306_v49, 5 }
  0x68   : > { %v969_v6 = vsel %vm1943_vm4, %v964_v61, %v968_v62  ;;  %v1004_v19 = vunpack.c.l.b16 %v955_v5  ;;  %v1318_v58 = vrot.slane %v1317_v50, 4  ;;  %v1322_v59 = vrot.slane %v1320_v51, 5  ;;  %v1761_v5 = vld [vmem:[%s1900_s16 + $0x3c] sm:$0xf0] }
  0x69   : > { %v1005_v20 = vunpack.c.l.b16 %v969_v6  ;;  %v1725_v11 = vor.u32 %v1761_v5, %v1724_v4  ;;  %v2164_v4 = vld [vmem:[%s2232_s5] ss:$0 sm:$0xff] }
  0x6a   : > { %v1323_v63 = vsel %vm1943_vm4, %v1318_v58, %v1322_v59 }
  0x6b   : > { %v1010_v37 = vpack.c.b16 %v1005_v20, %v1004_v19  ;;  %v1333_v7 = vunpack.c.l.b16 %v1323_v63 }
  0x74   : > { %1685 = vmatmul.msk.bf16.gmra.mxu1 %vm447_vm1, %v1009_v45  ;;  %v994_v45 = vshll.u32 %v383_v32, 16 }
  0x75   : > { %1706 = vmatmul.msk.bf16.gmra.mxu2 %vm447_vm1, %v1696_v52  ;;  %1727 = vmatmul.msk.bf16.gmra.mxu3 %vm447_vm1, %v1717_v53  ;;  %v978_v52 = vrot.slane %v977_v42, 4  ;;  %v982_v53 = vrot.slane %v980_v43, 5 }
  0x76   : > { %1732 = vmatmul.msk.bf16.gmra.mxu0 %vm447_vm1, %v1335_v56  ;;  %v996_v55 = vrot.slane %v994_v45, 5  ;;  %v1304_v56 = vrot.slane %v1303_v48, 4 }
  0x77   : > { %v983_v60 = vsel %vm1943_vm4, %v978_v52, %v982_v53 }
  0x78   : > { %v997_v61 = vsel %vm1943_vm4, %v992_v54, %v996_v55  ;;  %v1309_v62 = vsel %vm1943_vm4, %v1304_v56, %v1308_v57  ;;  %v1006_v0 = vunpack.c.l.b16 %v983_v60 }
  0x79   : > { %v1007_v1 = vunpack.c.l.b16 %v997_v61  ;;  %v1332_v6 = vunpack.c.l.b16 %v1309_v62 }
  0x7b   : > { %v1011_v8 = vpack.c.b16 %v1007_v1, %v1006_v0  ;;  %v1337_v12 = vpack.c.b16 %v1333_v7, %v1332_v6 }
  0x84   : > { %1686 = vmatmul.msk.bf16.gmra.mxu1 %vm447_vm1, %v1010_v37 }
  0x85   : > { %1707 = vmatmul.msk.bf16.gmra.mxu2 %vm447_vm1, %v1700_v38  ;;  %1728 = vmatmul.msk.bf16.gmra.mxu3 %vm447_vm1, %v1721_v39 }
  0x86   : > { %1733 = vmatmul.msk.bf16.gmra.mxu0 %vm447_vm1, %v1336_v47 }
  0x91   : > { %v478_v9 = vpop.f32.mrf.mxu1 }
  0x93   : > { %v473_v13 = vpop.f32.mrf.mxu0 }
  0x94   : > { %1687 = vmatmul.msk.bf16.gmra.mxu1 %vm447_vm1, %v1011_v8 }
  0x95   : > { %1708 = vmatmul.msk.bf16.gmra.mxu2 %vm447_vm1, %v1704_v10  ;;  %1729 = vmatmul.msk.bf16.gmra.mxu3 %vm447_vm1, %v1725_v11 }
  0x96   : > { %1734 = vmatmul.msk.bf16.gmra.mxu0 %vm447_vm1, %v1337_v12 }
  0x98   : > { %v2117_v46 = vpop.f32.mrf.mxu2  ;;  %v2119_v14 = vpop.f32.mrf.mxu3 }
  0x99   : > { %v2121_v15 = vpop.f32.mrf.mxu1 }
  0x9b   : > { %v475_v16 = vpop.f32.mrf.mxu0 }
  0xa0   : > { %v2123_v17 = vpop.f32.mrf.mxu2  ;;  %v2125_v18 = vpop.f32.mrf.mxu3 }
  0xa1   : > { %v537_v19 = vpop.f32.mrf.mxu1 }
  0xa2   : > { %v538_v49 = vadd.f32 %v537_v19, %v473_v13 }
  0xa3   : > { %v858_v20 = vpop.f32.mrf.mxu0 }
  0xa8   : > { %v710_v21 = vpop.f32.mrf.mxu2  ;;  %v784_v22 = vpop.f32.mrf.mxu3 }
  0xa9   : > { %v539_v23 = vpop.f32.mrf.mxu1  ;;  %v730_v51 = vadd.f32 %v710_v21, %v538_v49 }
  0xaa   : > { %v540_v56 = vadd.f32 %v539_v23, %v475_v16 }
  0xab   : > { %v860_v24 = vpop.f32.mrf.mxu0  ;;  %v804_v54 = vadd.f32 %v784_v22, %v730_v51 }
  0xad   : > { %v878_v59 = vadd.f32 %v858_v20, %v804_v54 }
  0xb0   : > { %v712_v25 = vpop.f32.mrf.mxu2  ;;  %v786_v26 = vpop.f32.mrf.mxu3 }
  0xb1   : > { %v542_v27 = vpop.f32.mrf.mxu1  ;;  %v731_v58 = vadd.f32 %v712_v25, %v540_v56 }
  0xb2   : > { %v543_v2 = vadd.f32 %v542_v27, %v478_v9 }
  0xb3   : > { %v863_v28 = vpop.f32.mrf.mxu0  ;;  %v805_v63 = vadd.f32 %v786_v26, %v731_v58 }
  0xb5   : > { %v879_v8 = vadd.f32 %v860_v24, %v805_v63 }
  0xb8   : > { %v715_v29 = vpop.f32.mrf.mxu2  ;;  %v789_v30 = vpop.f32.mrf.mxu3 }
  0xb9   : > { %v544_v31 = vpop.f32.mrf.mxu1  ;;  %v732_v6 = vadd.f32 %v715_v29, %v543_v2 }
  0xba   : > { %v545_v21 = vadd.f32 %v544_v31, %v2121_v15 }
  0xbb   : > { %v2127_v32 = vpop.f32.mrf.mxu0  ;;  %v806_v16 = vadd.f32 %v789_v30, %v732_v6 }
  0xbd   : > { %v880_v27 = vadd.f32 %v863_v28, %v806_v16 }
  0xc0   : > { %v717_v33 = vpop.f32.mrf.mxu2  ;;  %v791_v34 = vpop.f32.mrf.mxu3 }
  0xc1   : > { %v2129_v35 = vpop.f32.mrf.mxu1  ;;  %v733_v25 = vadd.f32 %v717_v33, %v545_v21 }
  0xc2   : > { %v548_v15 = vadd.f32 %v2129_v35, %v2117_v46 }
  0xc3   : > { %v2131_v36 = vpop.f32.mrf.mxu0  ;;  %v807_v54 = vadd.f32 %v791_v34, %v733_v25 }
  0xc8   : > { %v2133_v37 = vpop.f32.mrf.mxu2  ;;  %v2135_v38 = vpop.f32.mrf.mxu3 }
  0xc9   : > { %v2137_v39 = vpop.f32.mrf.mxu1 }
  0xca   : > { %v550_v2 = vadd.f32 %v2137_v39, %v2123_v17 }
  0xcb   : > { %v2139_v40 = vpop.f32.mrf.mxu0 }
  0xd0   : > { %v2141_v41 = vpop.f32.mrf.mxu2  ;;  %v2143_v42 = vpop.f32.mrf.mxu3 }
  0xd1   : > { %v2145_v43 = vpop.f32.mrf.mxu1 }
  0xd3   : > { %v2147_v44 = vpop.f32.mrf.mxu0 }
  0xd8   : > { %v2149_v45 = vpop.f32.mrf.mxu2  ;;  %v2151_v47 = vpop.f32.mrf.mxu3 }
  0xd9   : > { %v2153_v48 = vpop.f32.mrf.mxu1 }
  0xdb   : > { %v2155_v50 = vpop.f32.mrf.mxu0 }
  0xe0   : > { %v2157_v52 = vpop.f32.mrf.mxu2  ;;  %v2159_v53 = vpop.f32.mrf.mxu3 }
  0xe1   : > { %v1036_v55 = vpop.f32.mrf.mxu1 }
  0xe2   : > { %v1056_v60 = vadd.f32 %v1036_v55, %v878_v59  ;;  %v734_v59 = vadd.f32 %v2133_v37, %v548_v15 }
  0xe3   : > { %v1362_v57 = vpop.f32.mrf.mxu0 }
  0xe8   : > { %v1110_v61 = vpop.f32.mrf.mxu2  ;;  %v1184_v62 = vpop.f32.mrf.mxu3 }
  0xe9   : > { %v1130_v0 = vadd.f32 %v1110_v61, %v1056_v60  ;;  %v1038_v1 = vpop.f32.mrf.mxu1  ;;  %v881_v60 = vadd.f32 %v2127_v32, %v807_v54 }
  0xea   : > { %v1057_v11 = vadd.f32 %v1038_v1, %v879_v8 }
  0xeb   : > { %v1204_v3 = vadd.f32 %v1184_v62, %v1130_v0  ;;  %v1364_v5 = vpop.f32.mrf.mxu0  ;;  %v808_v0 = vadd.f32 %v2135_v38, %v734_v59 }
  0xed   : > { %v1382_v7 = vadd.f32 %v1362_v57, %v1204_v3  ;;  %v882_v6 = vadd.f32 %v2131_v36, %v808_v0 }
  0xef   : > { %v1394_v10 = vadd.f32 %v2164_v4, %v1382_v7 }
  0xf0   : > { %v1112_v12 = vpop.f32.mrf.mxu2  ;;  %v1186_v13 = vpop.f32.mrf.mxu3 }
  0xf1   : > { %v1402_v19 = vmax.f32 %v1394_v10, 0.0  ;;  %v1131_v20 = vadd.f32 %v1112_v12, %v1057_v11  ;;  %v1041_v9 = vpop.f32.mrf.mxu1 }
  0xf2   : > { %v1058_v30 = vadd.f32 %v1041_v9, %v880_v27 }
  0xf3   : > { %v1410_v22 = vpack.c.bf16 %v1402_v19, %v1402_v19  ;;  %v1205_v23 = vadd.f32 %v1186_v13, %v1131_v20  ;;  %v1367_v24 = vpop.f32.mrf.mxu0 }
  0xf5   : > { %1419 = vst.msk [vmem:[%s2171_s17] sm:$0xf] %vm1418_vm5, %v1410_v22  ;;  %v1383_v26 = vadd.f32 %v1364_v5, %v1205_v23  ;;  %v735_v5 = vadd.f32 %v2141_v41, %v550_v2  ;;  %v553_v41 = vadd.f32 %v2145_v43, %v2119_v14 }
  0xf7   : > { %v1395_v29 = vadd.f32 %v2164_v4, %v1383_v26  ;;  %v809_v12 = vadd.f32 %v2143_v42, %v735_v5  ;;  %v736_v20 = vadd.f32 %v2149_v45, %v553_v41  ;;  %v555_v45 = vadd.f32 %v2153_v48, %v2125_v18 }
  0xf8   : > { %v1115_v49 = vpop.f32.mrf.mxu2  ;;  %v1189_v51 = vpop.f32.mrf.mxu3 }
  0xf9   : > { %v1403_v55 = vmax.f32 %v1395_v29, 0.0  ;;  %v1132_v56 = vadd.f32 %v1115_v49, %v1058_v30  ;;  %v1043_v57 = vpop.f32.mrf.mxu1  ;;  %v883_v9 = vadd.f32 %v2139_v40, %v809_v12  ;;  %v810_v25 = vadd.f32 %v2151_v47, %v736_v20 }
  0xfa   : > { %v1059_v34 = vadd.f32 %v1043_v57, %v881_v60  ;;  %v737_v30 = vadd.f32 %v2157_v52, %v555_v45 }
  0xfb   : > { %v1411_v31 = vpack.c.bf16 %v1403_v55, %v1403_v55  ;;  %v1206_v58 = vadd.f32 %v1189_v51, %v1132_v56  ;;  %v1369_v33 = vpop.f32.mrf.mxu0  ;;  %v884_v49 = vadd.f32 %v2147_v44, %v810_v25 }
  0xfc   : > { %v811_v56 = vadd.f32 %v2159_v53, %v737_v30 }
  0xfd   : > { %1420 = vst.msk [vmem:[%s2171_s17 + $0x4] sm:$0xf] %vm1418_vm5, %v1411_v31  ;;  %v1384_v28 = vadd.f32 %v1367_v24, %v1206_v58 }
  0xfe   : > { %v885_v44 = vadd.f32 %v2155_v50, %v811_v56 }
  0xff   : > { %v1396_v61 = vadd.f32 %v2164_v4, %v1384_v28 }
 0x100   : > { %v1117_v62 = vpop.f32.mrf.mxu2  ;;  %v1191_v63 = vpop.f32.mrf.mxu3 }
 0x101   : > { %v1404_v1 = vmax.f32 %v1396_v61, 0.0  ;;  %v1133_v46 = vadd.f32 %v1117_v62, %v1059_v34  ;;  %v1046_v35 = vpop.f32.mrf.mxu1 }
 0x102   : > { %v1060_v38 = vadd.f32 %v1046_v35, %v882_v6 }
 0x103   : > { %v1412_v37 = vpack.c.bf16 %v1404_v1, %v1404_v1  ;;  %v1207_v3 = vadd.f32 %v1191_v63, %v1133_v46  ;;  %v1372_v7 = vpop.f32.mrf.mxu0 }
 0x105   : > { %1421 = vst.msk [vmem:[%s2171_s17 + $0x8] sm:$0xf] %vm1418_vm5, %v1412_v37  ;;  %v1385_v32 = vadd.f32 %v1369_v33, %v1207_v3 }
 0x107   : > { %v1397_v8 = vadd.f32 %v2164_v4, %v1385_v32 }
 0x108   : > { %v1120_v10 = vpop.f32.mrf.mxu2  ;;  %v1194_v11 = vpop.f32.mrf.mxu3 }
 0x109   : > { %v1405_v13 = vmax.f32 %v1397_v8, 0.0  ;;  %v1134_v17 = vadd.f32 %v1120_v10, %v1060_v38  ;;  %v1048_v39 = vpop.f32.mrf.mxu1 }
 0x10a   : > { %v1061_v22 = vadd.f32 %v1048_v39, %v883_v9 }
 0x10b   : > { %v1413_v16 = vpack.c.bf16 %v1405_v13, %v1405_v13  ;;  %v1208_v19 = vadd.f32 %v1194_v11, %v1134_v17  ;;  %v1374_v42 = vpop.f32.mrf.mxu0 }
 0x10d   : > { %1422 = vst.msk [vmem:[%s2171_s17 + $0xc] sm:$0xf] %vm1418_vm5, %v1413_v16  ;;  %v1386_v36 = vadd.f32 %v1372_v7, %v1208_v19 }
 0x10f   : > { %v1398_v21 = vadd.f32 %v2164_v4, %v1386_v36 }
 0x110   : > { %v1122_v23 = vpop.f32.mrf.mxu2  ;;  %v1196_v24 = vpop.f32.mrf.mxu3 }
 0x111   : > { %v1406_v26 = vmax.f32 %v1398_v21, 0.0  ;;  %v1135_v14 = vadd.f32 %v1122_v23, %v1061_v22  ;;  %v1051_v43 = vpop.f32.mrf.mxu1 }
 0x112   : > { %v1062_v54 = vadd.f32 %v1051_v43, %v884_v49 }
 0x113   : > { %v1414_v27 = vpack.c.bf16 %v1406_v26, %v1406_v26  ;;  %v1209_v29 = vadd.f32 %v1196_v24, %v1135_v14  ;;  %v1377_v18 = vpop.f32.mrf.mxu0 }
 0x115   : > { %1423 = vst.msk [vmem:[%s2171_s17 + $0x10] sm:$0xf] %vm1418_vm5, %v1414_v27  ;;  %v1387_v40 = vadd.f32 %v1374_v42, %v1209_v29 }
 0x117   : > { %v1399_v51 = vadd.f32 %v2164_v4, %v1387_v40 }
 0x118   : > { %v1125_v47 = vpop.f32.mrf.mxu2  ;;  %v1199_v55 = vpop.f32.mrf.mxu3 }
 0x119   : > { %v1407_v57 = vmax.f32 %v1399_v51, 0.0  ;;  %v1136_v15 = vadd.f32 %v1125_v47, %v1062_v54  ;;  %v1053_v58 = vpop.f32.mrf.mxu1 }
 0x11a   : > { %v1063_v59 = vadd.f32 %v1053_v58, %v885_v44 }
 0x11b   : > { %v1415_v48 = vpack.c.bf16 %v1407_v57, %v1407_v57  ;;  %v1210_v31 = vadd.f32 %v1199_v55, %v1136_v15  ;;  %v1379_v63 = vpop.f32.mrf.mxu0 }
 0x11d   : > { %1424 = vst.msk [vmem:[%s2171_s17 + $0x14] sm:$0xf] %vm1418_vm5, %v1415_v48  ;;  %v1388_v52 = vadd.f32 %v1377_v18, %v1210_v31 }
 0x11f   : > { %v1400_v33 = vadd.f32 %v2164_v4, %v1388_v52 }
 0x120   : > { %v1127_v28 = vpop.f32.mrf.mxu2  ;;  %v1201_v53 = vpop.f32.mrf.mxu3 }
 0x121   : > { %v1408_v60 = vmax.f32 %v1400_v33, 0.0  ;;  %v1137_v61 = vadd.f32 %v1127_v28, %v1063_v59 }
 0x123   : > { %v1416_v34 = vpack.c.bf16 %v1408_v60, %v1408_v60  ;;  %v1211_v62 = vadd.f32 %v1201_v53, %v1137_v61 }
 0x125   : > { %1425 = vst.msk [vmem:[%s2171_s17 + $0x18] sm:$0xf] %vm1418_vm5, %v1416_v34  ;;  %v1389_v0 = vadd.f32 %v1379_v63, %v1211_v62 }
 0x127   : > { %v1401_v1 = vadd.f32 %v2164_v4, %v1389_v0 }
 0x129   : > { %v1409_v46 = vmax.f32 %v1401_v1, 0.0 }
 0x12b   : > { %v1417_v35 = vpack.c.bf16 %v1409_v46, %v1409_v46 }
 0x12d   : > { %1426 = vst.msk [vmem:[%s2171_s17 + $0x1c] sm:$0xf] %vm1418_vm5, %v1417_v35 }
 0x12e PF: > { %s16_s23 = sadd.s32 1, %s1813_s23   ;;  %s2236_s21 = smov %s1809_s22 }
 0x12f   : > { %p13_p5 = scmp.ge.s32.totalorder %s16_s23, 4   ;;  %s2237_s22 = smov %s2239_s24 }
 0x131   :  { %15 = sbr.rel (!%p13_p5) target bundleno = 2 (0x2), region = 97 }

</bundles_post_ra>
